<compile_context>
chip_gen: v7x
topology: tpu7x:2x2x1
jax: 0.10.0
libtpu: 0.0.40
codegen_flags: <defaults>
</compile_context>

<pallas_src>
import functools
import math

import jax
import jax.numpy as jnp
from jax import lax
from jax.experimental import pallas as pl
from jax.experimental.pallas import tpu as pltpu


def _layernorm(v, gamma, beta, eps=1e-6):
    mu = jnp.mean(v, axis=-1, keepdims=True)
    var = jnp.mean(jnp.square(v - mu), axis=-1, keepdims=True)
    return gamma * (v - mu) * lax.rsqrt(var + eps) + beta


def encoder_layer_kernel(x_ref, mask_ref,
                         wq_ref, bq_ref, wk_ref, bk_ref, wv_ref, bv_ref,
                         wo_ref, bo_ref,
                         g1_ref, be1_ref, g2_ref, be2_ref,
                         w1_ref, bf1_ref, w2_ref, bf2_ref,
                         o_ref, k_sc, v_sc, *, num_heads, tq):
    i = pl.program_id(1)                  # query-tile index within the batch element
    S = x_ref.shape[1]
    D = x_ref.shape[2]
    dk = D // num_heads
    scale = 1.0 / math.sqrt(dk)

    # ---- build K / V for the full sequence once per batch element (tile 0) ----
    @pl.when(i == 0)
    def _():
        x_all = x_ref[0].astype(jnp.float32)                                  # (S, D)
        xn_all = _layernorm(x_all, g1_ref[...], be1_ref[...]).astype(jnp.bfloat16)
        k_sc[...] = (jnp.dot(xn_all, wk_ref[...], preferred_element_type=jnp.float32)
                     + bk_ref[...]).astype(jnp.bfloat16)
        v_sc[...] = (jnp.dot(xn_all, wv_ref[...], preferred_element_type=jnp.float32)
                     + bv_ref[...]).astype(jnp.bfloat16)

    # ---- sublayer 0: pre-LN multi-head self-attention + residual (query tile) ----
    row0 = pl.multiple_of(i * tq, tq)
    x_t = x_ref[0, pl.ds(row0, tq), :].astype(jnp.float32)                    # (tq, D)
    xn_t = _layernorm(x_t, g1_ref[...], be1_ref[...]).astype(jnp.bfloat16)
    q = (jnp.dot(xn_t, wq_ref[...], preferred_element_type=jnp.float32)
         + bq_ref[...]).astype(jnp.bfloat16)                                  # (tq, D)

    # additive mask bias hoisted out of the head loop: 0 = keep, -1e9 = padded key
    mbias = (mask_ref[0].astype(jnp.float32) - 1.0) * 1e9                     # (1, S)

    attn = jnp.zeros((tq, D), jnp.float32)
    for h in range(num_heads):            # static head loop (H is small)
        lo, hi = h * dk, (h + 1) * dk
        qh = q[:, lo:hi]                                                      # (tq, dk) bf16
        kh = k_sc[:, lo:hi]                                                   # (S,  dk) bf16
        vh = v_sc[:, lo:hi]                                                   # (S,  dk) bf16
        # Q @ K^T via dot_general contracting dim 1 of both -> no transpose copy.
        s = lax.dot_general(qh, kh, (((1,), (1,)), ((), ())),
                            preferred_element_type=jnp.float32)               # (tq, S)
        s = s * scale + mbias
        s = s - jnp.max(s, axis=-1, keepdims=True)
        p = jnp.exp(s)
        p = p * pl.reciprocal(jnp.sum(p, axis=-1, keepdims=True), approx=True)
        head = jnp.dot(p.astype(jnp.bfloat16), vh,
                       preferred_element_type=jnp.float32).astype(jnp.bfloat16)
        # accumulate straight into the Wo projection -> no head concat / relayout
        attn = attn + jnp.dot(head, wo_ref[lo:hi, :],
                              preferred_element_type=jnp.float32)
    attn = attn + bo_ref[...]
    h1 = x_t + attn   # TODO(synk): dropout omitted (deterministic / eval mode)

    # ---- sublayer 1: pre-LN position-wise feed-forward + residual ----
    hn = _layernorm(h1, g2_ref[...], be2_ref[...]).astype(jnp.bfloat16)
    ff = jnp.maximum(
        jnp.dot(hn, w1_ref[...], preferred_element_type=jnp.float32) + bf1_ref[...],
        0.0).astype(jnp.bfloat16)
    ff = jnp.dot(ff, w2_ref[...], preferred_element_type=jnp.float32) + bf2_ref[...]
    o_ref[0] = (h1 + ff).astype(o_ref.dtype)


def _vmem_limit_bytes(S, D, DFF, tq):
    """Rough per-grid-step VMEM footprint, with margin, clamped to [16, 64] MiB."""
    w_bytes = (4 * D * D + 2 * D * DFF) * 2                  # bf16 weight matrices
    vec_bytes = (6 * D + DFF) * 4                            # biases + LN params (f32)
    io_bytes = (S * D + tq * D + S) * 4                      # x block, out tile, mask
    kv_bytes = 2 * S * D * 2                                 # bf16 K/V scratch
    tmp_bytes = (3 * tq * S + tq * DFF + 6 * tq * D + 2 * S * D) * 4
    total = 2 * (w_bytes + vec_bytes + io_bytes) + kv_bytes + tmp_bytes   # x2 double-buffer
    return int(min(max(total * 2, 16 << 20), 64 << 20))


def encoder_layer(x, mask, params, *, num_heads, tq=None):
    B, S, D = x.shape
    DFF = params["w1"].shape[1]
    if tq is None:
        tq = S
        for cand in (512, 256, 128, 64, 32, 16, 8):
            if cand <= S and S % cand == 0:
                tq = cand
                break
    assert S % tq == 0, "sequence length must be divisible by the query tile"
    n_tq = S // tq

    bf16 = jnp.bfloat16
    wq = params["wq"].astype(bf16)
    wk = params["wk"].astype(bf16)
    wv = params["wv"].astype(bf16)
    wo = params["wo"].astype(bf16)
    w1 = params["w1"].astype(bf16)
    w2 = params["w2"].astype(bf16)

    full = lambda arr: pl.BlockSpec(arr.shape, lambda b, i: (0,) * arr.ndim)
    in_specs = [
        pl.BlockSpec((1, S, D), lambda b, i: (b, 0, 0)),   # x (full seq; row-sliced per tile)
        pl.BlockSpec((1, 1, S), lambda b, i: (b, 0, 0)),   # mask
        full(wq), full(params["bq"]),
        full(wk), full(params["bk"]),
        full(wv), full(params["bv"]),
        full(wo), full(params["bo"]),
        full(params["g1"]), full(params["be1"]),
        full(params["g2"]), full(params["be2"]),
        full(w1), full(params["bf1"]),
        full(w2), full(params["bf2"]),
    ]
    kernel = functools.partial(encoder_layer_kernel, num_heads=num_heads, tq=tq)
    return pl.pallas_call(
        kernel,
        out_shape=jax.ShapeDtypeStruct((B, S, D), jnp.float32),
        grid_spec=pltpu.PrefetchScalarGridSpec(
            num_scalar_prefetch=0,
            grid=(B, n_tq),
            in_specs=in_specs,
            out_specs=pl.BlockSpec((1, tq, D), lambda b, i: (b, i, 0)),
            scratch_shapes=[pltpu.VMEM((S, D), jnp.bfloat16),   # K cache
                            pltpu.VMEM((S, D), jnp.bfloat16)],  # V cache
        ),
        compiler_params=pltpu.CompilerParams(
            dimension_semantics=("parallel", "arbitrary"),
            vmem_limit_bytes=_vmem_limit_bytes(S, D, DFF, tq),
        ),
    )(x, mask,
      wq, params["bq"], wk, params["bk"], wv, params["bv"], wo, params["bo"],
      params["g1"], params["be1"], params["g2"], params["be2"],
      w1, params["bf1"], w2, params["bf2"])


def make_params(key, d_model, d_ff):
    ks = jax.random.split(key, 8)
    n = lambda k, shp: (jax.random.normal(k, shp, jnp.float32) * 0.05)
    return {
        "wq": n(ks[0], (d_model, d_model)), "bq": jnp.zeros((1, d_model), jnp.float32),
        "wk": n(ks[1], (d_model, d_model)), "bk": jnp.zeros((1, d_model), jnp.float32),
        "wv": n(ks[2], (d_model, d_model)), "bv": jnp.zeros((1, d_model), jnp.float32),
        "wo": n(ks[3], (d_model, d_model)), "bo": jnp.zeros((1, d_model), jnp.float32),
        "g1": jnp.ones((1, d_model), jnp.float32), "be1": jnp.zeros((1, d_model), jnp.float32),
        "g2": jnp.ones((1, d_model), jnp.float32), "be2": jnp.zeros((1, d_model), jnp.float32),
        "w1": n(ks[4], (d_model, d_ff)), "bf1": jnp.zeros((1, d_ff), jnp.float32),
        "w2": n(ks[5], (d_ff, d_model)), "bf2": jnp.zeros((1, d_model), jnp.float32),
    }


def encoder_layer_ref(x, mask, p, num_heads):
    """Pure-JAX (f32) reference for correctness checking."""
    B, S, D = x.shape
    dk = D // num_heads

    def ln(v, g, b):
        mu = v.mean(-1, keepdims=True)
        var = ((v - mu) ** 2).mean(-1, keepdims=True)
        return g * (v - mu) / jnp.sqrt(var + 1e-6) + b

    xn = ln(x, p["g1"], p["be1"])
    q = xn @ p["wq"] + p["bq"]
    k = xn @ p["wk"] + p["bk"]
    v = xn @ p["wv"] + p["bv"]
    q = q.reshape(B, S, num_heads, dk).transpose(0, 2, 1, 3)
    k = k.reshape(B, S, num_heads, dk).transpose(0, 2, 1, 3)
    v = v.reshape(B, S, num_heads, dk).transpose(0, 2, 1, 3)
    s = jnp.einsum("bhqd,bhkd->bhqk", q, k) / math.sqrt(dk)
    s = jnp.where(mask[:, None, :, :] > 0, s, -1e9)
    pattn = jax.nn.softmax(s, axis=-1)
    attn = jnp.einsum("bhqk,bhkd->bhqd", pattn, v).transpose(0, 2, 1, 3).reshape(B, S, D)
    attn = attn @ p["wo"] + p["bo"]
    h1 = x + attn
    hn = ln(h1, p["g2"], p["be2"])
    ff = jax.nn.relu(hn @ p["w1"] + p["bf1"]) @ p["w2"] + p["bf2"]
    return h1 + ff


if __name__ == "__main__":
    B, S, D, H, DFF = 2, 16, 32, 4, 64
    key = jax.random.PRNGKey(0)
    kx, kp = jax.random.split(key)
    x = jax.random.normal(kx, (B, S, D), jnp.float32)
    # mask: batch 0 fully valid, batch 1 has last 4 key positions padded
    mask = jnp.ones((B, 1, S), jnp.float32).at[1, 0, 12:].set(0.0)
    params = make_params(kp, D, DFF)

    out = encoder_layer(x, mask, params, num_heads=H, tq=8)   # 2 query tiles per batch
    out = jax.block_until_ready(out)

    ref = encoder_layer_ref(x, mask, params, H)
    assert out.shape == (B, S, D)
    # tolerance loosened for bf16 MXU operands + approx reciprocal
    max_err = float(jnp.max(jnp.abs(out - ref)))
    assert jnp.allclose(out, ref, atol=2e-2, rtol=2e-2), f"mismatch vs reference (max abs err {max_err})"
    print("KERNEL_OK")
</pallas_src>

<mosaic_0001>
module attributes {stable_mosaic.version = 11 : i64} {
  func.func @encoder_layer_kernel(%arg0: i32, %arg1: i32, %arg2: memref<1x16x32xf32, #tpu.memory_space<vmem>>, %arg3: memref<1x1x16xf32, #tpu.memory_space<vmem>>, %arg4: memref<32x32xbf16, #tpu.memory_space<vmem>>, %arg5: memref<1x32xf32, #tpu.memory_space<vmem>>, %arg6: memref<32x32xbf16, #tpu.memory_space<vmem>>, %arg7: memref<1x32xf32, #tpu.memory_space<vmem>>, %arg8: memref<32x32xbf16, #tpu.memory_space<vmem>>, %arg9: memref<1x32xf32, #tpu.memory_space<vmem>>, %arg10: memref<32x32xbf16, #tpu.memory_space<vmem>>, %arg11: memref<1x32xf32, #tpu.memory_space<vmem>>, %arg12: memref<1x32xf32, #tpu.memory_space<vmem>>, %arg13: memref<1x32xf32, #tpu.memory_space<vmem>>, %arg14: memref<1x32xf32, #tpu.memory_space<vmem>>, %arg15: memref<1x32xf32, #tpu.memory_space<vmem>>, %arg16: memref<32x64xbf16, #tpu.memory_space<vmem>>, %arg17: memref<1x64xf32, #tpu.memory_space<vmem>>, %arg18: memref<64x32xbf16, #tpu.memory_space<vmem>>, %arg19: memref<1x32xf32, #tpu.memory_space<vmem>>, %arg20: memref<1x8x32xf32, #tpu.memory_space<vmem>>, %arg21: memref<16x32xbf16, #tpu.memory_space<vmem>>, %arg22: memref<16x32xbf16, #tpu.memory_space<vmem>>) attributes {dimension_semantics = [#tpu.dimension_semantics<parallel>, #tpu.dimension_semantics<arbitrary>], iteration_bounds = array<i64: 2, 2>, scalar_prefetch = 0 : i64, scratch_operands = 2 : i64, tpu.core_type = #tpu.core_type<tc>, window_params = [{transform_indices = @transform_0, window_bounds = array<i64: 1, 16, 32>}, {transform_indices = @transform_1, window_bounds = array<i64: 1, 1, 16>}, {pipeline_mode = #tpu.pipeline_mode<synchronous>, transform_indices = @transform_2, window_bounds = array<i64: 32, 32>}, {pipeline_mode = #tpu.pipeline_mode<synchronous>, transform_indices = @transform_3, window_bounds = array<i64: 1, 32>}, {pipeline_mode = #tpu.pipeline_mode<synchronous>, transform_indices = @transform_4, window_bounds = array<i64: 32, 32>}, {pipeline_mode = #tpu.pipeline_mode<synchronous>, transform_indices = @transform_5, window_bounds = array<i64: 1, 32>}, {pipeline_mode = #tpu.pipeline_mode<synchronous>, transform_indices = @transform_6, window_bounds = array<i64: 32, 32>}, {pipeline_mode = #tpu.pipeline_mode<synchronous>, transform_indices = @transform_7, window_bounds = array<i64: 1, 32>}, {pipeline_mode = #tpu.pipeline_mode<synchronous>, transform_indices = @transform_8, window_bounds = array<i64: 32, 32>}, {pipeline_mode = #tpu.pipeline_mode<synchronous>, transform_indices = @transform_9, window_bounds = array<i64: 1, 32>}, {pipeline_mode = #tpu.pipeline_mode<synchronous>, transform_indices = @transform_10, window_bounds = array<i64: 1, 32>}, {pipeline_mode = #tpu.pipeline_mode<synchronous>, transform_indices = @transform_11, window_bounds = array<i64: 1, 32>}, {pipeline_mode = #tpu.pipeline_mode<synchronous>, transform_indices = @transform_12, window_bounds = array<i64: 1, 32>}, {pipeline_mode = #tpu.pipeline_mode<synchronous>, transform_indices = @transform_13, window_bounds = array<i64: 1, 32>}, {pipeline_mode = #tpu.pipeline_mode<synchronous>, transform_indices = @transform_14, window_bounds = array<i64: 32, 64>}, {pipeline_mode = #tpu.pipeline_mode<synchronous>, transform_indices = @transform_15, window_bounds = array<i64: 1, 64>}, {pipeline_mode = #tpu.pipeline_mode<synchronous>, transform_indices = @transform_16, window_bounds = array<i64: 64, 32>}, {pipeline_mode = #tpu.pipeline_mode<synchronous>, transform_indices = @transform_17, window_bounds = array<i64: 1, 32>}, {transform_indices = @transform_18, window_bounds = array<i64: 1, 8, 32>}]} {
    %c0_i32 = arith.constant 0 : i32
    %0 = arith.cmpi eq, %arg1, %c0_i32 : i32
    %1 = arith.extui %0 : i1 to i32
    %c0_i32_0 = arith.constant 0 : i32
    %2 = arith.cmpi ne, %1, %c0_i32_0 : i32
    scf.if %2 {
      %c0_91 = arith.constant 0 : index
      %c0_92 = arith.constant 0 : index
      %c0_93 = arith.constant 0 : index
      %188 = vector.load %arg2[%c0_91, %c0_92, %c0_93] : memref<1x16x32xf32, #tpu.memory_space<vmem>>, vector<1x16x32xf32>
      %189 = vector.shape_cast %188 : vector<1x16x32xf32> to vector<16x32xf32>
      %c0_94 = arith.constant 0 : index
      %c0_95 = arith.constant 0 : index
      %190 = vector.load %arg12[%c0_94, %c0_95] : memref<1x32xf32, #tpu.memory_space<vmem>>, vector<1x32xf32>
      %c0_96 = arith.constant 0 : index
      %c0_97 = arith.constant 0 : index
      %191 = vector.load %arg13[%c0_96, %c0_97] : memref<1x32xf32, #tpu.memory_space<vmem>>, vector<1x32xf32>
      %cst_98 = arith.constant dense<0.000000e+00> : vector<16xf32>
      %192 = vector.multi_reduction <add>, %189, %cst_98 [1] : vector<16x32xf32> to vector<16xf32>
      %193 = vector.shape_cast %192 : vector<16xf32> to vector<16x1xf32>
      %cst_99 = arith.constant 3.200000e+01 : f32
      %194 = vector.broadcast %cst_99 : f32 to vector<16x1xf32>
      %195 = arith.divf %193, %194 : vector<16x1xf32>
      %196 = vector.broadcast %195 : vector<16x1xf32> to vector<16x32xf32>
      %197 = arith.subf %189, %196 : vector<16x32xf32>
      %198 = arith.mulf %197, %197 : vector<16x32xf32>
      %cst_100 = arith.constant dense<0.000000e+00> : vector<16xf32>
      %199 = vector.multi_reduction <add>, %198, %cst_100 [1] : vector<16x32xf32> to vector<16xf32>
      %200 = vector.shape_cast %199 : vector<16xf32> to vector<16x1xf32>
      %cst_101 = arith.constant 3.200000e+01 : f32
      %201 = vector.broadcast %cst_101 : f32 to vector<16x1xf32>
      %202 = arith.divf %200, %201 : vector<16x1xf32>
      %203 = vector.broadcast %195 : vector<16x1xf32> to vector<16x32xf32>
      %204 = arith.subf %189, %203 : vector<16x32xf32>
      %205 = vector.broadcast %190 : vector<1x32xf32> to vector<16x32xf32>
      %206 = arith.mulf %205, %204 : vector<16x32xf32>
      %cst_102 = arith.constant 9.99999997E-7 : f32
      %207 = vector.broadcast %cst_102 : f32 to vector<16x1xf32>
      %208 = arith.addf %202, %207 : vector<16x1xf32>
      %209 = math.rsqrt %208 : vector<16x1xf32>
      %210 = vector.broadcast %209 : vector<16x1xf32> to vector<16x32xf32>
      %211 = arith.mulf %206, %210 : vector<16x32xf32>
      %212 = vector.broadcast %191 : vector<1x32xf32> to vector<16x32xf32>
      %213 = arith.addf %211, %212 : vector<16x32xf32>
      %214 = arith.truncf %213 : vector<16x32xf32> to vector<16x32xbf16>
      %c0_103 = arith.constant 0 : index
      %c0_104 = arith.constant 0 : index
      %215 = vector.load %arg6[%c0_103, %c0_104] : memref<32x32xbf16, #tpu.memory_space<vmem>>, vector<32x32xbf16>
      %cst_105 = arith.constant dense<0.000000e+00> : vector<16x32xf32>
      %216 = tpu.matmul %214, %215, %cst_105 {dimension_numbers = #tpu.dot_dimension_numbers<[1], [0], [0], [1], [0, 0, 1, 1], [], []>} : vector<16x32xbf16>, vector<32x32xbf16>, vector<16x32xf32> -> vector<16x32xf32>
      %c0_106 = arith.constant 0 : index
      %c0_107 = arith.constant 0 : index
      %217 = vector.load %arg7[%c0_106, %c0_107] : memref<1x32xf32, #tpu.memory_space<vmem>>, vector<1x32xf32>
      %218 = vector.broadcast %217 : vector<1x32xf32> to vector<16x32xf32>
      %219 = arith.addf %216, %218 : vector<16x32xf32>
      %220 = arith.truncf %219 : vector<16x32xf32> to vector<16x32xbf16>
      %c0_108 = arith.constant 0 : index
      %c0_109 = arith.constant 0 : index
      %221 = vector.load %arg21[%c0_108, %c0_109] : memref<16x32xbf16, #tpu.memory_space<vmem>>, vector<16x32xbf16>
      tpu.vector_store %arg21[%c0_108, %c0_109], %220 {strides = array<i32>} : memref<16x32xbf16, #tpu.memory_space<vmem>>, vector<16x32xbf16>,
      %c0_110 = arith.constant 0 : index
      %c0_111 = arith.constant 0 : index
      %222 = vector.load %arg8[%c0_110, %c0_111] : memref<32x32xbf16, #tpu.memory_space<vmem>>, vector<32x32xbf16>
      %cst_112 = arith.constant dense<0.000000e+00> : vector<16x32xf32>
      %223 = tpu.matmul %214, %222, %cst_112 {dimension_numbers = #tpu.dot_dimension_numbers<[1], [0], [0], [1], [0, 0, 1, 1], [], []>} : vector<16x32xbf16>, vector<32x32xbf16>, vector<16x32xf32> -> vector<16x32xf32>
      %c0_113 = arith.constant 0 : index
      %c0_114 = arith.constant 0 : index
      %224 = vector.load %arg9[%c0_113, %c0_114] : memref<1x32xf32, #tpu.memory_space<vmem>>, vector<1x32xf32>
      %225 = vector.broadcast %224 : vector<1x32xf32> to vector<16x32xf32>
      %226 = arith.addf %223, %225 : vector<16x32xf32>
      %227 = arith.truncf %226 : vector<16x32xf32> to vector<16x32xbf16>
      %c0_115 = arith.constant 0 : index
      %c0_116 = arith.constant 0 : index
      %228 = vector.load %arg22[%c0_115, %c0_116] : memref<16x32xbf16, #tpu.memory_space<vmem>>, vector<16x32xbf16>
      tpu.vector_store %arg22[%c0_115, %c0_116], %227 {strides = array<i32>} : memref<16x32xbf16, #tpu.memory_space<vmem>>, vector<16x32xbf16>,
    } else {
    }
    %c8_i32 = arith.constant 8 : i32
    %3 = arith.muli %arg1, %c8_i32 : i32
    %4 = tpu.assume_multiple %3, 8 : i32
    %c0 = arith.constant 0 : index
    %5 = arith.index_cast %4 : i32 to index
    %c0_1 = arith.constant 0 : index
    %6 = vector.load %arg2[%c0, %5, %c0_1] : memref<1x16x32xf32, #tpu.memory_space<vmem>>, vector<1x8x32xf32>
    %7 = vector.shape_cast %6 : vector<1x8x32xf32> to vector<8x32xf32>
    %c0_2 = arith.constant 0 : index
    %c0_3 = arith.constant 0 : index
    %8 = vector.load %arg12[%c0_2, %c0_3] : memref<1x32xf32, #tpu.memory_space<vmem>>, vector<1x32xf32>
    %c0_4 = arith.constant 0 : index
    %c0_5 = arith.constant 0 : index
    %9 = vector.load %arg13[%c0_4, %c0_5] : memref<1x32xf32, #tpu.memory_space<vmem>>, vector<1x32xf32>
    %cst = arith.constant dense<0.000000e+00> : vector<8xf32>
    %10 = vector.multi_reduction <add>, %7, %cst [1] : vector<8x32xf32> to vector<8xf32>
    %11 = vector.shape_cast %10 : vector<8xf32> to vector<8x1xf32>
    %cst_6 = arith.constant 3.200000e+01 : f32
    %12 = vector.broadcast %cst_6 : f32 to vector<8x1xf32>
    %13 = arith.divf %11, %12 : vector<8x1xf32>
    %14 = vector.broadcast %13 : vector<8x1xf32> to vector<8x32xf32>
    %15 = arith.subf %7, %14 : vector<8x32xf32>
    %16 = arith.mulf %15, %15 : vector<8x32xf32>
    %cst_7 = arith.constant dense<0.000000e+00> : vector<8xf32>
    %17 = vector.multi_reduction <add>, %16, %cst_7 [1] : vector<8x32xf32> to vector<8xf32>
    %18 = vector.shape_cast %17 : vector<8xf32> to vector<8x1xf32>
    %cst_8 = arith.constant 3.200000e+01 : f32
    %19 = vector.broadcast %cst_8 : f32 to vector<8x1xf32>
    %20 = arith.divf %18, %19 : vector<8x1xf32>
    %21 = vector.broadcast %13 : vector<8x1xf32> to vector<8x32xf32>
    %22 = arith.subf %7, %21 : vector<8x32xf32>
    %23 = vector.broadcast %8 : vector<1x32xf32> to vector<8x32xf32>
    %24 = arith.mulf %23, %22 : vector<8x32xf32>
    %cst_9 = arith.constant 9.99999997E-7 : f32
    %25 = vector.broadcast %cst_9 : f32 to vector<8x1xf32>
    %26 = arith.addf %20, %25 : vector<8x1xf32>
    %27 = math.rsqrt %26 : vector<8x1xf32>
    %28 = vector.broadcast %27 : vector<8x1xf32> to vector<8x32xf32>
    %29 = arith.mulf %24, %28 : vector<8x32xf32>
    %30 = vector.broadcast %9 : vector<1x32xf32> to vector<8x32xf32>
    %31 = arith.addf %29, %30 : vector<8x32xf32>
    %32 = arith.truncf %31 : vector<8x32xf32> to vector<8x32xbf16>
    %c0_10 = arith.constant 0 : index
    %c0_11 = arith.constant 0 : index
    %33 = vector.load %arg4[%c0_10, %c0_11] : memref<32x32xbf16, #tpu.memory_space<vmem>>, vector<32x32xbf16>
    %cst_12 = arith.constant dense<0.000000e+00> : vector<8x32xf32>
    %34 = tpu.matmul %32, %33, %cst_12 {dimension_numbers = #tpu.dot_dimension_numbers<[1], [0], [0], [1], [0, 0, 1, 1], [], []>} : vector<8x32xbf16>, vector<32x32xbf16>, vector<8x32xf32> -> vector<8x32xf32>
    %c0_13 = arith.constant 0 : index
    %c0_14 = arith.constant 0 : index
    %35 = vector.load %arg5[%c0_13, %c0_14] : memref<1x32xf32, #tpu.memory_space<vmem>>, vector<1x32xf32>
    %36 = vector.broadcast %35 : vector<1x32xf32> to vector<8x32xf32>
    %37 = arith.addf %34, %36 : vector<8x32xf32>
    %38 = arith.truncf %37 : vector<8x32xf32> to vector<8x32xbf16>
    %c0_15 = arith.constant 0 : index
    %c0_16 = arith.constant 0 : index
    %c0_17 = arith.constant 0 : index
    %39 = vector.load %arg3[%c0_15, %c0_16, %c0_17] : memref<1x1x16xf32, #tpu.memory_space<vmem>>, vector<1x1x16xf32>
    %40 = vector.shape_cast %39 : vector<1x1x16xf32> to vector<1x16xf32>
    %cst_18 = arith.constant 1.000000e+00 : f32
    %41 = vector.broadcast %cst_18 : f32 to vector<1x16xf32>
    %42 = arith.subf %40, %41 : vector<1x16xf32>
    %cst_19 = arith.constant 1.000000e+09 : f32
    %43 = vector.broadcast %cst_19 : f32 to vector<1x16xf32>
    %44 = arith.mulf %42, %43 : vector<1x16xf32>
    %cst_20 = arith.constant 0.000000e+00 : f32
    %45 = vector.broadcast %cst_20 : f32 to vector<8x32xf32>
    %46 = vector.extract_strided_slice %38 {offsets = [0, 0], sizes = [8, 8], strides = [1, 1]} : vector<8x32xbf16> to vector<8x8xbf16>
    %c0_21 = arith.constant 0 : index
    %c0_22 = arith.constant 0 : index
    %47 = vector.load %arg21[%c0_21, %c0_22] : memref<16x32xbf16, #tpu.memory_space<vmem>>, vector<16x8xbf16>
    %c0_23 = arith.constant 0 : index
    %c0_24 = arith.constant 0 : index
    %48 = vector.load %arg22[%c0_23, %c0_24] : memref<16x32xbf16, #tpu.memory_space<vmem>>, vector<16x8xbf16>
    %cst_25 = arith.constant dense<0.000000e+00> : vector<8x16xf32>
    %49 = tpu.matmul %46, %47, %cst_25 {dimension_numbers = #tpu.dot_dimension_numbers<[1], [1], [0], [0], [0, 0, 1, 0], [], []>} : vector<8x8xbf16>, vector<16x8xbf16>, vector<8x16xf32> -> vector<8x16xf32>
    %cst_26 = arith.constant 0.353553385 : f32
    %50 = vector.broadcast %cst_26 : f32 to vector<8x16xf32>
    %51 = arith.mulf %49, %50 : vector<8x16xf32>
    %52 = vector.broadcast %44 : vector<1x16xf32> to vector<8x16xf32>
    %53 = arith.addf %51, %52 : vector<8x16xf32>
    %cst_27 = arith.constant dense<0xFF800000> : vector<8xf32>
    %54 = vector.multi_reduction <maximumf>, %53, %cst_27 [1] : vector<8x16xf32> to vector<8xf32>
    %55 = vector.shape_cast %54 : vector<8xf32> to vector<8x1xf32>
    %56 = vector.broadcast %55 : vector<8x1xf32> to vector<8x16xf32>
    %57 = arith.subf %53, %56 : vector<8x16xf32>
    %58 = math.exp %57 : vector<8x16xf32>
    %cst_28 = arith.constant dense<0.000000e+00> : vector<8xf32>
    %59 = vector.multi_reduction <add>, %58, %cst_28 [1] : vector<8x16xf32> to vector<8xf32>
    %60 = vector.shape_cast %59 : vector<8xf32> to vector<8x1xf32>
    %61 = tpu.reciprocal %60 {approx = true} : vector<8x1xf32> -> vector<8x1xf32>
    %62 = vector.broadcast %61 : vector<8x1xf32> to vector<8x16xf32>
    %63 = arith.mulf %58, %62 : vector<8x16xf32>
    %64 = arith.truncf %63 : vector<8x16xf32> to vector<8x16xbf16>
    %cst_29 = arith.constant dense<0.000000e+00> : vector<8x8xf32>
    %65 = tpu.matmul %64, %48, %cst_29 {dimension_numbers = #tpu.dot_dimension_numbers<[1], [0], [0], [1], [0, 0, 1, 1], [], []>} : vector<8x16xbf16>, vector<16x8xbf16>, vector<8x8xf32> -> vector<8x8xf32>
    %66 = arith.truncf %65 : vector<8x8xf32> to vector<8x8xbf16>
    %c0_30 = arith.constant 0 : index
    %c0_31 = arith.constant 0 : index
    %67 = vector.load %arg10[%c0_30, %c0_31] : memref<32x32xbf16, #tpu.memory_space<vmem>>, vector<8x32xbf16>
    %cst_32 = arith.constant dense<0.000000e+00> : vector<8x32xf32>
    %68 = tpu.matmul %66, %67, %cst_32 {dimension_numbers = #tpu.dot_dimension_numbers<[1], [0], [0], [1], [0, 0, 1, 1], [], []>} : vector<8x8xbf16>, vector<8x32xbf16>, vector<8x32xf32> -> vector<8x32xf32>
    %69 = arith.addf %45, %68 : vector<8x32xf32>
    %70 = vector.extract_strided_slice %38 {offsets = [0, 8], sizes = [8, 8], strides = [1, 1]} : vector<8x32xbf16> to vector<8x8xbf16>
    %c0_33 = arith.constant 0 : index
    %c8 = arith.constant 8 : index
    %71 = vector.load %arg21[%c0_33, %c8] : memref<16x32xbf16, #tpu.memory_space<vmem>>, vector<16x8xbf16>
    %c0_34 = arith.constant 0 : index
    %c8_35 = arith.constant 8 : index
    %72 = vector.load %arg22[%c0_34, %c8_35] : memref<16x32xbf16, #tpu.memory_space<vmem>>, vector<16x8xbf16>
    %cst_36 = arith.constant dense<0.000000e+00> : vector<8x16xf32>
    %73 = tpu.matmul %70, %71, %cst_36 {dimension_numbers = #tpu.dot_dimension_numbers<[1], [1], [0], [0], [0, 0, 1, 0], [], []>} : vector<8x8xbf16>, vector<16x8xbf16>, vector<8x16xf32> -> vector<8x16xf32>
    %cst_37 = arith.constant 0.353553385 : f32
    %74 = vector.broadcast %cst_37 : f32 to vector<8x16xf32>
    %75 = arith.mulf %73, %74 : vector<8x16xf32>
    %76 = vector.broadcast %44 : vector<1x16xf32> to vector<8x16xf32>
    %77 = arith.addf %75, %76 : vector<8x16xf32>
    %cst_38 = arith.constant dense<0xFF800000> : vector<8xf32>
    %78 = vector.multi_reduction <maximumf>, %77, %cst_38 [1] : vector<8x16xf32> to vector<8xf32>
    %79 = vector.shape_cast %78 : vector<8xf32> to vector<8x1xf32>
    %80 = vector.broadcast %79 : vector<8x1xf32> to vector<8x16xf32>
    %81 = arith.subf %77, %80 : vector<8x16xf32>
    %82 = math.exp %81 : vector<8x16xf32>
    %cst_39 = arith.constant dense<0.000000e+00> : vector<8xf32>
    %83 = vector.multi_reduction <add>, %82, %cst_39 [1] : vector<8x16xf32> to vector<8xf32>
    %84 = vector.shape_cast %83 : vector<8xf32> to vector<8x1xf32>
    %85 = tpu.reciprocal %84 {approx = true} : vector<8x1xf32> -> vector<8x1xf32>
    %86 = vector.broadcast %85 : vector<8x1xf32> to vector<8x16xf32>
    %87 = arith.mulf %82, %86 : vector<8x16xf32>
    %88 = arith.truncf %87 : vector<8x16xf32> to vector<8x16xbf16>
    %cst_40 = arith.constant dense<0.000000e+00> : vector<8x8xf32>
    %89 = tpu.matmul %88, %72, %cst_40 {dimension_numbers = #tpu.dot_dimension_numbers<[1], [0], [0], [1], [0, 0, 1, 1], [], []>} : vector<8x16xbf16>, vector<16x8xbf16>, vector<8x8xf32> -> vector<8x8xf32>
    %90 = arith.truncf %89 : vector<8x8xf32> to vector<8x8xbf16>
    %c8_41 = arith.constant 8 : index
    %c0_42 = arith.constant 0 : index
    %91 = vector.load %arg10[%c8_41, %c0_42] : memref<32x32xbf16, #tpu.memory_space<vmem>>, vector<8x32xbf16>
    %cst_43 = arith.constant dense<0.000000e+00> : vector<8x32xf32>
    %92 = tpu.matmul %90, %91, %cst_43 {dimension_numbers = #tpu.dot_dimension_numbers<[1], [0], [0], [1], [0, 0, 1, 1], [], []>} : vector<8x8xbf16>, vector<8x32xbf16>, vector<8x32xf32> -> vector<8x32xf32>
    %93 = arith.addf %69, %92 : vector<8x32xf32>
    %94 = vector.extract_strided_slice %38 {offsets = [0, 16], sizes = [8, 8], strides = [1, 1]} : vector<8x32xbf16> to vector<8x8xbf16>
    %c0_44 = arith.constant 0 : index
    %c16 = arith.constant 16 : index
    %95 = vector.load %arg21[%c0_44, %c16] : memref<16x32xbf16, #tpu.memory_space<vmem>>, vector<16x8xbf16>
    %c0_45 = arith.constant 0 : index
    %c16_46 = arith.constant 16 : index
    %96 = vector.load %arg22[%c0_45, %c16_46] : memref<16x32xbf16, #tpu.memory_space<vmem>>, vector<16x8xbf16>
    %cst_47 = arith.constant dense<0.000000e+00> : vector<8x16xf32>
    %97 = tpu.matmul %94, %95, %cst_47 {dimension_numbers = #tpu.dot_dimension_numbers<[1], [1], [0], [0], [0, 0, 1, 0], [], []>} : vector<8x8xbf16>, vector<16x8xbf16>, vector<8x16xf32> -> vector<8x16xf32>
    %cst_48 = arith.constant 0.353553385 : f32
    %98 = vector.broadcast %cst_48 : f32 to vector<8x16xf32>
    %99 = arith.mulf %97, %98 : vector<8x16xf32>
    %100 = vector.broadcast %44 : vector<1x16xf32> to vector<8x16xf32>
    %101 = arith.addf %99, %100 : vector<8x16xf32>
    %cst_49 = arith.constant dense<0xFF800000> : vector<8xf32>
    %102 = vector.multi_reduction <maximumf>, %101, %cst_49 [1] : vector<8x16xf32> to vector<8xf32>
    %103 = vector.shape_cast %102 : vector<8xf32> to vector<8x1xf32>
    %104 = vector.broadcast %103 : vector<8x1xf32> to vector<8x16xf32>
    %105 = arith.subf %101, %104 : vector<8x16xf32>
    %106 = math.exp %105 : vector<8x16xf32>
    %cst_50 = arith.constant dense<0.000000e+00> : vector<8xf32>
    %107 = vector.multi_reduction <add>, %106, %cst_50 [1] : vector<8x16xf32> to vector<8xf32>
    %108 = vector.shape_cast %107 : vector<8xf32> to vector<8x1xf32>
    %109 = tpu.reciprocal %108 {approx = true} : vector<8x1xf32> -> vector<8x1xf32>
    %110 = vector.broadcast %109 : vector<8x1xf32> to vector<8x16xf32>
    %111 = arith.mulf %106, %110 : vector<8x16xf32>
    %112 = arith.truncf %111 : vector<8x16xf32> to vector<8x16xbf16>
    %cst_51 = arith.constant dense<0.000000e+00> : vector<8x8xf32>
    %113 = tpu.matmul %112, %96, %cst_51 {dimension_numbers = #tpu.dot_dimension_numbers<[1], [0], [0], [1], [0, 0, 1, 1], [], []>} : vector<8x16xbf16>, vector<16x8xbf16>, vector<8x8xf32> -> vector<8x8xf32>
    %114 = arith.truncf %113 : vector<8x8xf32> to vector<8x8xbf16>
    %c16_52 = arith.constant 16 : index
    %c0_53 = arith.constant 0 : index
    %115 = vector.load %arg10[%c16_52, %c0_53] : memref<32x32xbf16, #tpu.memory_space<vmem>>, vector<8x32xbf16>
    %cst_54 = arith.constant dense<0.000000e+00> : vector<8x32xf32>
    %116 = tpu.matmul %114, %115, %cst_54 {dimension_numbers = #tpu.dot_dimension_numbers<[1], [0], [0], [1], [0, 0, 1, 1], [], []>} : vector<8x8xbf16>, vector<8x32xbf16>, vector<8x32xf32> -> vector<8x32xf32>
    %117 = arith.addf %93, %116 : vector<8x32xf32>
    %118 = vector.extract_strided_slice %38 {offsets = [0, 24], sizes = [8, 8], strides = [1, 1]} : vector<8x32xbf16> to vector<8x8xbf16>
    %c0_55 = arith.constant 0 : index
    %c24 = arith.constant 24 : index
    %119 = vector.load %arg21[%c0_55, %c24] : memref<16x32xbf16, #tpu.memory_space<vmem>>, vector<16x8xbf16>
    %c0_56 = arith.constant 0 : index
    %c24_57 = arith.constant 24 : index
    %120 = vector.load %arg22[%c0_56, %c24_57] : memref<16x32xbf16, #tpu.memory_space<vmem>>, vector<16x8xbf16>
    %cst_58 = arith.constant dense<0.000000e+00> : vector<8x16xf32>
    %121 = tpu.matmul %118, %119, %cst_58 {dimension_numbers = #tpu.dot_dimension_numbers<[1], [1], [0], [0], [0, 0, 1, 0], [], []>} : vector<8x8xbf16>, vector<16x8xbf16>, vector<8x16xf32> -> vector<8x16xf32>
    %cst_59 = arith.constant 0.353553385 : f32
    %122 = vector.broadcast %cst_59 : f32 to vector<8x16xf32>
    %123 = arith.mulf %121, %122 : vector<8x16xf32>
    %124 = vector.broadcast %44 : vector<1x16xf32> to vector<8x16xf32>
    %125 = arith.addf %123, %124 : vector<8x16xf32>
    %cst_60 = arith.constant dense<0xFF800000> : vector<8xf32>
    %126 = vector.multi_reduction <maximumf>, %125, %cst_60 [1] : vector<8x16xf32> to vector<8xf32>
    %127 = vector.shape_cast %126 : vector<8xf32> to vector<8x1xf32>
    %128 = vector.broadcast %127 : vector<8x1xf32> to vector<8x16xf32>
    %129 = arith.subf %125, %128 : vector<8x16xf32>
    %130 = math.exp %129 : vector<8x16xf32>
    %cst_61 = arith.constant dense<0.000000e+00> : vector<8xf32>
    %131 = vector.multi_reduction <add>, %130, %cst_61 [1] : vector<8x16xf32> to vector<8xf32>
    %132 = vector.shape_cast %131 : vector<8xf32> to vector<8x1xf32>
    %133 = tpu.reciprocal %132 {approx = true} : vector<8x1xf32> -> vector<8x1xf32>
    %134 = vector.broadcast %133 : vector<8x1xf32> to vector<8x16xf32>
    %135 = arith.mulf %130, %134 : vector<8x16xf32>
    %136 = arith.truncf %135 : vector<8x16xf32> to vector<8x16xbf16>
    %cst_62 = arith.constant dense<0.000000e+00> : vector<8x8xf32>
    %137 = tpu.matmul %136, %120, %cst_62 {dimension_numbers = #tpu.dot_dimension_numbers<[1], [0], [0], [1], [0, 0, 1, 1], [], []>} : vector<8x16xbf16>, vector<16x8xbf16>, vector<8x8xf32> -> vector<8x8xf32>
    %138 = arith.truncf %137 : vector<8x8xf32> to vector<8x8xbf16>
    %c24_63 = arith.constant 24 : index
    %c0_64 = arith.constant 0 : index
    %139 = vector.load %arg10[%c24_63, %c0_64] : memref<32x32xbf16, #tpu.memory_space<vmem>>, vector<8x32xbf16>
    %cst_65 = arith.constant dense<0.000000e+00> : vector<8x32xf32>
    %140 = tpu.matmul %138, %139, %cst_65 {dimension_numbers = #tpu.dot_dimension_numbers<[1], [0], [0], [1], [0, 0, 1, 1], [], []>} : vector<8x8xbf16>, vector<8x32xbf16>, vector<8x32xf32> -> vector<8x32xf32>
    %141 = arith.addf %117, %140 : vector<8x32xf32>
    %c0_66 = arith.constant 0 : index
    %c0_67 = arith.constant 0 : index
    %142 = vector.load %arg11[%c0_66, %c0_67] : memref<1x32xf32, #tpu.memory_space<vmem>>, vector<1x32xf32>
    %143 = vector.broadcast %142 : vector<1x32xf32> to vector<8x32xf32>
    %144 = arith.addf %141, %143 : vector<8x32xf32>
    %145 = arith.addf %7, %144 : vector<8x32xf32>
    %c0_68 = arith.constant 0 : index
    %c0_69 = arith.constant 0 : index
    %146 = vector.load %arg14[%c0_68, %c0_69] : memref<1x32xf32, #tpu.memory_space<vmem>>, vector<1x32xf32>
    %c0_70 = arith.constant 0 : index
    %c0_71 = arith.constant 0 : index
    %147 = vector.load %arg15[%c0_70, %c0_71] : memref<1x32xf32, #tpu.memory_space<vmem>>, vector<1x32xf32>
    %cst_72 = arith.constant dense<0.000000e+00> : vector<8xf32>
    %148 = vector.multi_reduction <add>, %145, %cst_72 [1] : vector<8x32xf32> to vector<8xf32>
    %149 = vector.shape_cast %148 : vector<8xf32> to vector<8x1xf32>
    %cst_73 = arith.constant 3.200000e+01 : f32
    %150 = vector.broadcast %cst_73 : f32 to vector<8x1xf32>
    %151 = arith.divf %149, %150 : vector<8x1xf32>
    %152 = vector.broadcast %151 : vector<8x1xf32> to vector<8x32xf32>
    %153 = arith.subf %145, %152 : vector<8x32xf32>
    %154 = arith.mulf %153, %153 : vector<8x32xf32>
    %cst_74 = arith.constant dense<0.000000e+00> : vector<8xf32>
    %155 = vector.multi_reduction <add>, %154, %cst_74 [1] : vector<8x32xf32> to vector<8xf32>
    %156 = vector.shape_cast %155 : vector<8xf32> to vector<8x1xf32>
    %cst_75 = arith.constant 3.200000e+01 : f32
    %157 = vector.broadcast %cst_75 : f32 to vector<8x1xf32>
    %158 = arith.divf %156, %157 : vector<8x1xf32>
    %159 = vector.broadcast %151 : vector<8x1xf32> to vector<8x32xf32>
    %160 = arith.subf %145, %159 : vector<8x32xf32>
    %161 = vector.broadcast %146 : vector<1x32xf32> to vector<8x32xf32>
    %162 = arith.mulf %161, %160 : vector<8x32xf32>
    %cst_76 = arith.constant 9.99999997E-7 : f32
    %163 = vector.broadcast %cst_76 : f32 to vector<8x1xf32>
    %164 = arith.addf %158, %163 : vector<8x1xf32>
    %165 = math.rsqrt %164 : vector<8x1xf32>
    %166 = vector.broadcast %165 : vector<8x1xf32> to vector<8x32xf32>
    %167 = arith.mulf %162, %166 : vector<8x32xf32>
    %168 = vector.broadcast %147 : vector<1x32xf32> to vector<8x32xf32>
    %169 = arith.addf %167, %168 : vector<8x32xf32>
    %170 = arith.truncf %169 : vector<8x32xf32> to vector<8x32xbf16>
    %c0_77 = arith.constant 0 : index
    %c0_78 = arith.constant 0 : index
    %171 = vector.load %arg16[%c0_77, %c0_78] : memref<32x64xbf16, #tpu.memory_space<vmem>>, vector<32x64xbf16>
    %cst_79 = arith.constant dense<0.000000e+00> : vector<8x64xf32>
    %172 = tpu.matmul %170, %171, %cst_79 {dimension_numbers = #tpu.dot_dimension_numbers<[1], [0], [0], [1], [0, 0, 1, 1], [], []>} : vector<8x32xbf16>, vector<32x64xbf16>, vector<8x64xf32> -> vector<8x64xf32>
    %c0_80 = arith.constant 0 : index
    %c0_81 = arith.constant 0 : index
    %173 = vector.load %arg17[%c0_80, %c0_81] : memref<1x64xf32, #tpu.memory_space<vmem>>, vector<1x64xf32>
    %174 = vector.broadcast %173 : vector<1x64xf32> to vector<8x64xf32>
    %175 = arith.addf %172, %174 : vector<8x64xf32>
    %cst_82 = arith.constant 0.000000e+00 : f32
    %176 = vector.broadcast %cst_82 : f32 to vector<8x64xf32>
    %177 = arith.maximumf %175, %176 : vector<8x64xf32>
    %178 = arith.truncf %177 : vector<8x64xf32> to vector<8x64xbf16>
    %c0_83 = arith.constant 0 : index
    %c0_84 = arith.constant 0 : index
    %179 = vector.load %arg18[%c0_83, %c0_84] : memref<64x32xbf16, #tpu.memory_space<vmem>>, vector<64x32xbf16>
    %cst_85 = arith.constant dense<0.000000e+00> : vector<8x32xf32>
    %180 = tpu.matmul %178, %179, %cst_85 {dimension_numbers = #tpu.dot_dimension_numbers<[1], [0], [0], [1], [0, 0, 1, 1], [], []>} : vector<8x64xbf16>, vector<64x32xbf16>, vector<8x32xf32> -> vector<8x32xf32>
    %c0_86 = arith.constant 0 : index
    %c0_87 = arith.constant 0 : index
    %181 = vector.load %arg19[%c0_86, %c0_87] : memref<1x32xf32, #tpu.memory_space<vmem>>, vector<1x32xf32>
    %182 = vector.broadcast %181 : vector<1x32xf32> to vector<8x32xf32>
    %183 = arith.addf %180, %182 : vector<8x32xf32>
    %184 = arith.addf %145, %183 : vector<8x32xf32>
    %c0_88 = arith.constant 0 : index
    %c0_89 = arith.constant 0 : index
    %c0_90 = arith.constant 0 : index
    %185 = vector.load %arg20[%c0_88, %c0_89, %c0_90] : memref<1x8x32xf32, #tpu.memory_space<vmem>>, vector<1x8x32xf32>
    %186 = vector.shape_cast %185 : vector<1x8x32xf32> to vector<8x32xf32>
    %187 = vector.shape_cast %184 : vector<8x32xf32> to vector<1x8x32xf32>
    tpu.vector_store %arg20[%c0_88, %c0_89, %c0_90], %187 {strides = array<i32>} : memref<1x8x32xf32, #tpu.memory_space<vmem>>, vector<1x8x32xf32>,
    return
  }
  func.func @transform_0(%arg0: i32, %arg1: i32) -> (i32, i32, i32) {
    %c0_i32 = arith.constant 0 : i32
    %c0_i32_0 = arith.constant 0 : i32
    %c0_i32_1 = arith.constant 0 : i32
    return %arg0, %c0_i32, %c0_i32_0 : i32, i32, i32
  }
  func.func @transform_1(%arg0: i32, %arg1: i32) -> (i32, i32, i32) {
    %c0_i32 = arith.constant 0 : i32
    %c0_i32_0 = arith.constant 0 : i32
    %c0_i32_1 = arith.constant 0 : i32
    return %arg0, %c0_i32, %c0_i32_0 : i32, i32, i32
  }
  func.func @transform_2(%arg0: i32, %arg1: i32) -> (i32, i32) {
    %c0_i32 = arith.constant 0 : i32
    %c0_i32_0 = arith.constant 0 : i32
    %c0_i32_1 = arith.constant 0 : i32
    return %c0_i32, %c0_i32_0 : i32, i32
  }
  func.func @transform_3(%arg0: i32, %arg1: i32) -> (i32, i32) {
    %c0_i32 = arith.constant 0 : i32
    %c0_i32_0 = arith.constant 0 : i32
    %c0_i32_1 = arith.constant 0 : i32
    return %c0_i32, %c0_i32_0 : i32, i32
  }
  func.func @transform_4(%arg0: i32, %arg1: i32) -> (i32, i32) {
    %c0_i32 = arith.constant 0 : i32
    %c0_i32_0 = arith.constant 0 : i32
    %c0_i32_1 = arith.constant 0 : i32
    return %c0_i32, %c0_i32_0 : i32, i32
  }
  func.func @transform_5(%arg0: i32, %arg1: i32) -> (i32, i32) {
    %c0_i32 = arith.constant 0 : i32
    %c0_i32_0 = arith.constant 0 : i32
    %c0_i32_1 = arith.constant 0 : i32
    return %c0_i32, %c0_i32_0 : i32, i32
  }
  func.func @transform_6(%arg0: i32, %arg1: i32) -> (i32, i32) {
    %c0_i32 = arith.constant 0 : i32
    %c0_i32_0 = arith.constant 0 : i32
    %c0_i32_1 = arith.constant 0 : i32
    return %c0_i32, %c0_i32_0 : i32, i32
  }
  func.func @transform_7(%arg0: i32, %arg1: i32) -> (i32, i32) {
    %c0_i32 = arith.constant 0 : i32
    %c0_i32_0 = arith.constant 0 : i32
    %c0_i32_1 = arith.constant 0 : i32
    return %c0_i32, %c0_i32_0 : i32, i32
  }
  func.func @transform_8(%arg0: i32, %arg1: i32) -> (i32, i32) {
    %c0_i32 = arith.constant 0 : i32
    %c0_i32_0 = arith.constant 0 : i32
    %c0_i32_1 = arith.constant 0 : i32
    return %c0_i32, %c0_i32_0 : i32, i32
  }
  func.func @transform_9(%arg0: i32, %arg1: i32) -> (i32, i32) {
    %c0_i32 = arith.constant 0 : i32
    %c0_i32_0 = arith.constant 0 : i32
    %c0_i32_1 = arith.constant 0 : i32
    return %c0_i32, %c0_i32_0 : i32, i32
  }
  func.func @transform_10(%arg0: i32, %arg1: i32) -> (i32, i32) {
    %c0_i32 = arith.constant 0 : i32
    %c0_i32_0 = arith.constant 0 : i32
    %c0_i32_1 = arith.constant 0 : i32
    return %c0_i32, %c0_i32_0 : i32, i32
  }
  func.func @transform_11(%arg0: i32, %arg1: i32) -> (i32, i32) {
    %c0_i32 = arith.constant 0 : i32
    %c0_i32_0 = arith.constant 0 : i32
    %c0_i32_1 = arith.constant 0 : i32
    return %c0_i32, %c0_i32_0 : i32, i32
  }
  func.func @transform_12(%arg0: i32, %arg1: i32) -> (i32, i32) {
    %c0_i32 = arith.constant 0 : i32
    %c0_i32_0 = arith.constant 0 : i32
    %c0_i32_1 = arith.constant 0 : i32
    return %c0_i32, %c0_i32_0 : i32, i32
  }
  func.func @transform_13(%arg0: i32, %arg1: i32) -> (i32, i32) {
    %c0_i32 = arith.constant 0 : i32
    %c0_i32_0 = arith.constant 0 : i32
    %c0_i32_1 = arith.constant 0 : i32
    return %c0_i32, %c0_i32_0 : i32, i32
  }
  func.func @transform_14(%arg0: i32, %arg1: i32) -> (i32, i32) {
    %c0_i32 = arith.constant 0 : i32
    %c0_i32_0 = arith.constant 0 : i32
    %c0_i32_1 = arith.constant 0 : i32
    return %c0_i32, %c0_i32_0 : i32, i32
  }
  func.func @transform_15(%arg0: i32, %arg1: i32) -> (i32, i32) {
    %c0_i32 = arith.constant 0 : i32
    %c0_i32_0 = arith.constant 0 : i32
    %c0_i32_1 = arith.constant 0 : i32
    return %c0_i32, %c0_i32_0 : i32, i32
  }
  func.func @transform_16(%arg0: i32, %arg1: i32) -> (i32, i32) {
    %c0_i32 = arith.constant 0 : i32
    %c0_i32_0 = arith.constant 0 : i32
    %c0_i32_1 = arith.constant 0 : i32
    return %c0_i32, %c0_i32_0 : i32, i32
  }
  func.func @transform_17(%arg0: i32, %arg1: i32) -> (i32, i32) {
    %c0_i32 = arith.constant 0 : i32
    %c0_i32_0 = arith.constant 0 : i32
    %c0_i32_1 = arith.constant 0 : i32
    return %c0_i32, %c0_i32_0 : i32, i32
  }
  func.func @transform_18(%arg0: i32, %arg1: i32) -> (i32, i32, i32) {
    %c0_i32 = arith.constant 0 : i32
    %c0_i32_0 = arith.constant 0 : i32
    return %arg0, %arg1, %c0_i32 : i32, i32, i32
  }
}

</mosaic_0001>

<bundles_post_ra>
// kernel: tpu_custom_call.1
= control target key start
LH: loop header
LB: loop body
LE: loop exit
PB: predicated region body
PF: predicated region fallthrough
CT: control target
= control target key end

     0   :  { %s3372_s0 = inlined_call_operand.vmem [shape: f32[2,16,32], index: 0, kind: input, shape index: {}]   ;;  %s3373_s1 = inlined_call_operand.vmem [shape: f32[2,1,16], index: 1, kind: input, shape index: {}]   ;;  %s3374_s2 = inlined_call_operand.vmem [shape: bf16[32,32], index: 2, kind: input, shape index: {}]   ;;  %s3375_s3 = inlined_call_operand.hbm [shape: f32[1,32], index: 3, kind: input, shape index: {}]   ;;  %s3376_s4 = inlined_call_operand.hbm [shape: bf16[32,32], index: 4, kind: input, shape index: {}]   ;;  %s3377_s5 = inlined_call_operand.hbm [shape: f32[1,32], index: 5, kind: input, shape index: {}]   ;;  %s3378_s6 = inlined_call_operand.hbm [shape: bf16[32,32], index: 6, kind: input, shape index: {}]   ;;  %s3379_s7 = inlined_call_operand.hbm [shape: f32[1,32], index: 7, kind: input, shape index: {}]   ;;  %s3380_s8 = inlined_call_operand.hbm [shape: bf16[32,32], index: 8, kind: input, shape index: {}]   ;;  %s3381_s9 = inlined_call_operand.hbm [shape: f32[1,32], index: 9, kind: input, shape index: {}]   ;;  %s3382_s10 = inlined_call_operand.vmem [shape: f32[1,32], index: 10, kind: input, shape index: {}]   ;;  %s3383_s11 = inlined_call_operand.vmem [shape: f32[1,32], index: 11, kind: input, shape index: {}]   ;;  %s3384_s12 = inlined_call_operand.vmem [shape: f32[1,32], index: 12, kind: input, shape index: {}]   ;;  %s3385_s13 = inlined_call_operand.vmem [shape: f32[1,32], index: 13, kind: input, shape index: {}]   ;;  %s3386_s14 = inlined_call_operand.vmem [shape: bf16[32,64], index: 14, kind: input, shape index: {}]   ;;  %s3387_s15 = inlined_call_operand.vmem [shape: f32[1,64], index: 15, kind: input, shape index: {}]   ;;  %s3388_s16 = inlined_call_operand.vmem [shape: bf16[64,32], index: 16, kind: input, shape index: {}]   ;;  %s3389_s17 = inlined_call_operand.vmem [shape: f32[1,32], index: 17, kind: input, shape index: {}]   ;;  %s3390_s18 = inlined_call_operand.hbm [shape: f32[2,16,32], index: 18, kind: output, shape index: {}]  }
   0x1   :  { %3409 = sst [smem:[#allocation32_spill]] %s3372_s0 }
   0x2   :  { %3410 = sst [smem:[#allocation33_spill]] %s3373_s1 }
   0x3   :  { %3411 = sst [smem:[#allocation34_spill]] %s3374_s2 }
   0x4   :  { %3412 = sst [smem:[#allocation35_spill]] %s3384_s12 }
   0x5   :  { %3413 = sst [smem:[#allocation36_spill]] %s3385_s13 }
   0x6   :  { %3414 = sst [smem:[#allocation37_spill]] %s3387_s15 }
   0x7   :  { %3415 = sst [smem:[#allocation38_spill]] %s3388_s16 }
   0x8   :  { %3416 = sst [smem:[#allocation39_spill]] %s3389_s17 }
   0x9   :  { %3417 = sst [smem:[#allocation40_spill]] %s3390_s18 }
   0xa   :  { %23 = vsyncpa [#allocation5], 0 }
   0xb   :  { %24 = vsyncpa [#allocation8], 0 }
   0xc   :  { %25 = vsyncpa [#allocation11], 0 }
   0xd   :  { %26 = vsyncpa [#allocation14], 0 }
   0xe   :  { %27 = vsyncpa [#allocation6], 0 }
   0xf   :  { %29 = vsyncpa [#allocation6 + $0x1], 0  ;;  %s2827_s27 = smov 0   ;;  %s2829_s28 = smov 0  }
  0x10   :  { %s2831_s29 = smov 0   ;;  %s2833_s30 = smov 0  }
  0x11   :  { %s2835_s0 = smov 0   ;;  %s2837_s19 = smov 0  }
  0x12   :  { %s2839_s1 = smov 0   ;;  %s2841_s20 = smov 0  }
  0x13 LB: > { %3418 = sst [smem:[#allocation22_spill]] %s2685_s27  ;;  %s1991_s21 = sadd.s32 4294967295, %s2713_s20   ;;  %s2713_s20 = sphi %s2841_s20, %s35_s20   ;;  %s2709_s1 = sphi %s2839_s1, %s3457_s1   ;;  %s2705_s19 = sphi %s2837_s19, %s3456_s19   ;;  %s2701_s0 = sphi %s2835_s0, %s3455_s0   ;;  %s2697_s30 = sphi %s2833_s30, %s3454_s30   ;;  %s2693_s29 = sphi %s2831_s29, %s3453_s29   ;;  %s2689_s28 = sphi %s2829_s28, %s3459_s28   ;;  %s2685_s27 = sphi %s2827_s27, %s3458_s27  }
  0x14   : > { %3419 = sst [smem:[#allocation23_spill]] %s2693_s29  ;;  %s1992_s22 = sadd.s32 4294967294, %s2713_s20  }
  0x15   : > { %3420 = sst [smem:[#allocation24_spill]] %s2705_s19  ;;  %s44_s2 = sadd.s32 1, %s2705_s19 }
  0x16   : > { %3421 = sst [smem:[#allocation25_spill]] %s2709_s1  ;;  %s47_s23 = sadd.s32 1, %s2709_s1 }
  0x17   : > { %3422 = sst [smem:[#allocation26_spill]] %s2713_s20  ;;  %p45_p0 = scmp.ge.s32.totalorder %s44_s2, 2 }
  0x18   : > { %s444_s24 = sadd.s32 1, %s2693_s29  ;;  %p454_p1 = scmp.ne.s32.totalorder %s2693_s29, %s2689_s28 }
  0x19   : > { %p455_p2 = scmp.eq.s32.totalorder %s1991_s21, 3  ;;  %s3461_s2 = smov (%p45_p0, %s44_s2), 0 }
  0x1a   : > { %3423 = sst [smem:[#allocation27_spill]] %s3461_s2  ;;  %s3463_s23 = smov (!%p45_p0, %s47_s23), %s2709_s1 }
  0x1b   : > { %s440_s25 = ssub.s32 %s2705_s19, %s3461_s2  ;;  %p2879_p3 = por %p455_p2, %p454_p1 }
  0x1c   : > { %p49_p4 = scmp.ge.s32.totalorder %s3463_s23, 2  ;;  %p460_p5 = scmp.ne.s32.totalorder %s2689_s28, %s2685_s27 }
  0x1d   : > { %s3424_s26 = scalar_select %p2879_p3, 1, 0 }
  0x1e   : > { %p461_p6 = scmp.eq.s32.totalorder %s1992_s22, 3  ;;  %p1993_p7 = scmp.ge.s32.totalorder %s2713_s20, 1 }
  0x1f   : > { %3425 = sst [smem:[#allocation28_spill]] %s3424_s26  ;;  %s3465_s23 = smov (%p49_p4, %s3463_s23), 0 }
  0x20   : > { %3426 = sst [smem:[#allocation29_spill]] %s3465_s23  ;;  %p2888_p8 = por %p461_p6, %p460_p5 }
  0x21   : > { %p468_p9 = scmp.lt.s32.totalorder %s2713_s20, 5  ;;  %s439_s17 = ssub.s32 %s2709_s1, %s3465_s23 }
  0x22   : > { %s3427_s18 = scalar_select %p2888_p8, 1, 0 }
  0x23   : > { %s441_s15 = sor.u32 %s440_s25, %s439_s17  ;;  %p2895_p10 = pnand %p1993_p7, %p468_p9 }
  0x24   : > { %3428 = sst [smem:[#allocation30_spill]] %s3427_s18  ;;  %p442_p11 = scmp.eq.s32.totalorder %s441_s15, 0 }
  0x25   : > { %s3429_s2 = scalar_select %p2895_p10, 1, 0 }
  0x26   : > { %p2899_p12 = scmp.eq.s32.totalorder %s1991_s21, 0  ;;  %p2250_p13 = pneg %p2895_p10 }
  0x27   : > { %s2906_s22 = scalar_select %p442_p11, %s2693_s29, %s444_s24  }
  0x28   : > { %s3430_s19 = scalar_select %p2899_p12, 1, 0 }
  0x29   : > { %3431 = sst [smem:[#allocation31_spill]] %s2906_s22  ;;  %p2910_p0 = pnand %p2899_p12, %p2250_p13 }
  0x2a   : > { %s2715_s17 = smov [#allocation7]   ;;  %s2407_s21 = scalar_lea.hbm %s3376_s4, 256 }
  0x2b   : > { %s494_s25 = sshll.u32 %s2715_s17, 4  ;;  %p2408_p1 = scmp.ne.s32.totalorder %s3376_s4, %s2407_s21  ;;  %s495_s25 = int_to_ptr.vmem [resolvable:$true] %s494_s25 }
  0x2c   : > { %p2922_p2 = pneg %p2910_p0  ;;  %p2414_p6 = scmp.lt.u32.totalorder %s2407_s21, %s3376_s4 }
  0x2e   : > { %p2410_p4 = pnand %p2922_p2, %p2408_p1 }
  0x30   : > { %p2411_p5 = pneg %p2410_p4 }
  0x32   : > { %p2416_p7 = pnand %p2414_p6, %p2411_p5 }
  0x34   : > { %2419 = shalt.err (!%p2416_p7)
}
  0x35   : > { %s2420_s23 = scalar_lea.vmem %s495_s25, 256  ;;  %p2428_p8 = scmp.lt.s32.totalorder %s495_s25, %s495_s25 }
  0x36   : > { %p2421_p9 = scmp.ne.s32.totalorder %s495_s25, %s2420_s23  ;;  %p2429_p3 = scmp.lt.s32.totalorder %s2420_s23, %s2420_s23 }
  0x38   : > { %p2423_p11 = pnand %p2421_p9, %p2922_p2  ;;  %p2430_p12 = por %p2429_p3, %p2428_p8 }
  0x3a   : > { %p2424_p13 = pneg %p2423_p11 }
  0x3c   : > { %p2431_p10 = pnand %p2430_p12, %p2424_p13 }
  0x3e   : > { %2434 = shalt.err (!%p2431_p10)
}
  0x3f   : > { %s2716_s27 = smov 64   ;;  %s2717_s1 = smov 4  }
  0x40   : > { %2256 = dma.hbm_to_vmem [thread:$0]  (!%p2910_p0), %s3376_s4, 256, %s495_s25, [#allocation8], %s2716_s27, %s2716_s27, %s2717_s1  }
  0x41   : > { %s2718_s21 = smov [#allocation10]   ;;  %s2719_s29 = smov [#allocation13]  }
  0x42   : > { %s518_s17 = sshll.u32 %s2718_s21, 4  ;;  %s542_s20 = sshll.u32 %s2719_s29, 4  ;;  %s519_s17 = int_to_ptr.vmem [resolvable:$true] %s518_s17  ;;  %s2941_s20 = int_to_ptr.vmem [resolvable:$true] %s542_s20 }
  0x43   : > { %s2435_s13 = scalar_lea.hbm %s3378_s6, 256 }
  0x44   : > { %p2436_p3 = scmp.ne.s32.totalorder %s3378_s6, %s2435_s13  ;;  %p2442_p12 = scmp.lt.u32.totalorder %s2435_s13, %s3378_s6 }
  0x46   : > { %p2438_p8 = pnand %p2436_p3, %p2922_p2 }
  0x48   : > { %p2439_p10 = pneg %p2438_p8 }
  0x4a   : > { %p2444_p1 = pnand %p2442_p12, %p2439_p10 }
  0x4c   : > { %2447 = shalt.err (!%p2444_p1)
}
  0x4d   : > { %s2448_s29 = scalar_lea.vmem %s519_s17, 256  ;;  %p2456_p7 = scmp.lt.s32.totalorder %s519_s17, %s519_s17 }
  0x4e   : > { %p2449_p4 = scmp.ne.s32.totalorder %s519_s17, %s2448_s29  ;;  %p2457_p9 = scmp.lt.s32.totalorder %s2448_s29, %s2448_s29 }
  0x50   : > { %p2451_p5 = pnand %p2449_p4, %p2922_p2  ;;  %p2458_p11 = por %p2457_p9, %p2456_p7 }
  0x52   : > { %p2452_p6 = pneg %p2451_p5 }
  0x54   : > { %p2459_p13 = pnand %p2458_p11, %p2452_p6 }
  0x56   : > { %2462 = shalt.err (!%p2459_p13)
}
  0x57   : > { %2262 = dma.hbm_to_vmem [thread:$0]  (!%p2910_p0), %s3378_s6, 256, %s519_s17, [#allocation11], %s2716_s27, %s2716_s27, %s2717_s1  }
  0x58   : > { %s2463_s15 = scalar_lea.hbm %s3380_s8, 256 }
  0x59   : > { %p2464_p3 = scmp.ne.s32.totalorder %s3380_s8, %s2463_s15  ;;  %p2470_p12 = scmp.lt.u32.totalorder %s2463_s15, %s3380_s8 }
  0x5b   : > { %p2466_p8 = pnand %p2464_p3, %p2922_p2 }
  0x5d   : > { %p2467_p10 = pneg %p2466_p8 }
  0x5f   : > { %p2472_p1 = pnand %p2470_p12, %p2467_p10 }
  0x61   : > { %2475 = shalt.err (!%p2472_p1)
}
  0x62   : > { %s2476_s17 = scalar_lea.vmem %s2941_s20, 256  ;;  %p2484_p7 = scmp.lt.s32.totalorder %s2941_s20, %s2941_s20 }
  0x63   : > { %p2477_p4 = scmp.ne.s32.totalorder %s2941_s20, %s2476_s17  ;;  %p2485_p9 = scmp.lt.s32.totalorder %s2476_s17, %s2476_s17 }
  0x65   : > { %p2479_p5 = pnand %p2477_p4, %p2922_p2  ;;  %p2486_p11 = por %p2485_p9, %p2484_p7 }
  0x67   : > { %p2480_p6 = pneg %p2479_p5 }
  0x69   : > { %p2487_p13 = pnand %p2486_p11, %p2480_p6 }
  0x6b   : > { %2490 = shalt.err (!%p2487_p13)
}
  0x6c   : > { %2268 = dma.hbm_to_vmem [thread:$0]  (!%p2910_p0), %s3380_s8, 256, %s2941_s20, [#allocation14], %s2716_s27, %s2716_s27, %s2717_s1  }
  0x6d   : > { %s2720_s13 = smov [#allocation4]   ;;  %s2721_s26 = smov [#allocation9]  }
  0x6e   : > { %s484_s16 = sshll.u32 %s2720_s13, 4  ;;  %s508_s15 = sshll.u32 %s2721_s26, 4  ;;  %s485_s16 = int_to_ptr.vmem [resolvable:$true] %s484_s16  ;;  %s2990_s15 = int_to_ptr.vmem [resolvable:$true] %s508_s15 }
  0x6f   : > { %s2491_s22 = scalar_lea.hbm %s3375_s3, 16 }
  0x70   : > { %p2492_p3 = scmp.ne.s32.totalorder %s3375_s3, %s2491_s22  ;;  %p2498_p12 = scmp.lt.u32.totalorder %s2491_s22, %s3375_s3 }
  0x72   : > { %p2494_p8 = pnand %p2492_p3, %p2922_p2 }
  0x74   : > { %p2495_p10 = pneg %p2494_p8 }
  0x76   : > { %p2500_p1 = pnand %p2498_p12, %p2495_p10 }
  0x78   : > { %2503 = shalt.err (!%p2500_p1)
}
  0x79   : > { %s2504_s27 = scalar_lea.vmem %s485_s16, 16  ;;  %s2511_s1 = scalar_lea.vmem %s485_s16, 32 }
  0x7a   : > { %p2505_p4 = scmp.ne.s32.totalorder %s485_s16, %s2504_s27  ;;  %p2512_p7 = scmp.lt.s32.totalorder %s485_s16, %s485_s16 }
  0x7b   : > { %p2513_p9 = scmp.lt.s32.totalorder %s2511_s1, %s2504_s27 }
  0x7c   : > { %p2507_p5 = pnand %p2505_p4, %p2922_p2 }
  0x7d   : > { %p2514_p11 = por %p2513_p9, %p2512_p7 }
  0x7e   : > { %p2508_p6 = pneg %p2507_p5 }
  0x80   : > { %p2515_p13 = pnand %p2514_p11, %p2508_p6 }
  0x82   : > { %2518 = shalt.err (!%p2515_p13)
}
  0x83   : > { %2253 = dma.hbm_to_vmem [thread:$0]  (!%p2910_p0), %s3375_s3, 16, %s485_s16, [#allocation5]  }
  0x84   : > { %s2519_s23 = scalar_lea.hbm %s3377_s5, 16 }
  0x85   : > { %p2520_p3 = scmp.ne.s32.totalorder %s3377_s5, %s2519_s23  ;;  %p2526_p12 = scmp.lt.u32.totalorder %s2519_s23, %s3377_s5 }
  0x87   : > { %p2522_p8 = pnand %p2520_p3, %p2922_p2 }
  0x89   : > { %p2523_p10 = pneg %p2522_p8 }
  0x8b   : > { %p2528_p1 = pnand %p2526_p12, %p2523_p10 }
  0x8d   : > { %2531 = shalt.err (!%p2528_p1)
}
  0x8e   : > { %s2532_s16 = scalar_lea.vmem %s2990_s15, 16  ;;  %s2539_s20 = scalar_lea.vmem %s2990_s15, 32 }
  0x8f   : > { %p2533_p4 = scmp.ne.s32.totalorder %s2990_s15, %s2532_s16  ;;  %p2540_p7 = scmp.lt.s32.totalorder %s2990_s15, %s2990_s15 }
  0x90   : > { %p2541_p9 = scmp.lt.s32.totalorder %s2539_s20, %s2532_s16 }
  0x91   : > { %p2535_p5 = pnand %p2533_p4, %p2922_p2 }
  0x92   : > { %p2542_p11 = por %p2541_p9, %p2540_p7 }
  0x93   : > { %p2536_p6 = pneg %p2535_p5 }
  0x95   : > { %p2543_p13 = pnand %p2542_p11, %p2536_p6 }
  0x97   : > { %2546 = shalt.err (!%p2543_p13)
}
  0x98   : > { %2259 = dma.hbm_to_vmem [thread:$0]  (!%p2910_p0), %s3377_s5, 16, %s2990_s15, [#allocation8]  }
  0x99   : > { %s2722_s12 = smov [#allocation12]   ;;  %s2723_s26 = smov [#allocation15]  }
  0x9a   : > { %s532_s13 = sshll.u32 %s2722_s12, 4  ;;  %s556_s21 = sshll.u32 %s2723_s26, 4  ;;  %s533_s13 = int_to_ptr.vmem [resolvable:$true] %s532_s13  ;;  %s3034_s21 = int_to_ptr.vmem [resolvable:$true] %s556_s21 }
  0x9b   : > { %s2547_s25 = scalar_lea.hbm %s3379_s7, 16 }
  0x9c   : > { %p2548_p3 = scmp.ne.s32.totalorder %s3379_s7, %s2547_s25  ;;  %p2554_p12 = scmp.lt.u32.totalorder %s2547_s25, %s3379_s7 }
  0x9e   : > { %p2550_p8 = pnand %p2548_p3, %p2922_p2 }
  0xa0   : > { %p2551_p10 = pneg %p2550_p8 }
  0xa2   : > { %p2556_p1 = pnand %p2554_p12, %p2551_p10 }
  0xa4   : > { %2559 = shalt.err (!%p2556_p1)
}
  0xa5   : > { %s2560_s20 = scalar_lea.vmem %s533_s13, 16  ;;  %s2567_s27 = scalar_lea.vmem %s533_s13, 32 }
  0xa6   : > { %p2561_p4 = scmp.ne.s32.totalorder %s533_s13, %s2560_s20  ;;  %p2568_p7 = scmp.lt.s32.totalorder %s533_s13, %s533_s13 }
  0xa7   : > { %p2569_p9 = scmp.lt.s32.totalorder %s2567_s27, %s2560_s20 }
  0xa8   : > { %p2563_p5 = pnand %p2561_p4, %p2922_p2 }
  0xa9   : > { %p2570_p11 = por %p2569_p9, %p2568_p7 }
  0xaa   : > { %p2564_p6 = pneg %p2563_p5 }
  0xac   : > { %p2571_p13 = pnand %p2570_p11, %p2564_p6 }
  0xae   : > { %2574 = shalt.err (!%p2571_p13)
}
  0xaf   : > { %2265 = dma.hbm_to_vmem [thread:$0]  (!%p2910_p0), %s3379_s7, 16, %s533_s13, [#allocation11]  }
  0xb0   : > { %s2575_s22 = scalar_lea.hbm %s3381_s9, 16 }
  0xb1   : > { %p2576_p3 = scmp.ne.s32.totalorder %s3381_s9, %s2575_s22  ;;  %p2582_p12 = scmp.lt.u32.totalorder %s2575_s22, %s3381_s9 }
  0xb3   : > { %p2578_p8 = pnand %p2576_p3, %p2922_p2 }
  0xb5   : > { %p2579_p10 = pneg %p2578_p8 }
  0xb7   : > { %p2584_p1 = pnand %p2582_p12, %p2579_p10 }
  0xb9   : > { %2587 = shalt.err (!%p2584_p1)
}
  0xba   : > { %s2588_s13 = scalar_lea.vmem %s3034_s21, 16  ;;  %s2595_s15 = scalar_lea.vmem %s3034_s21, 32 }
  0xbb   : > { %p2589_p4 = scmp.ne.s32.totalorder %s3034_s21, %s2588_s13  ;;  %p2596_p7 = scmp.lt.s32.totalorder %s3034_s21, %s3034_s21 }
  0xbc   : > { %p2597_p9 = scmp.lt.s32.totalorder %s2595_s15, %s2588_s13 }
  0xbd   : > { %p2591_p5 = pnand %p2589_p4, %p2922_p2 }
  0xbe   : > { %p2598_p11 = por %p2597_p9, %p2596_p7 }
  0xbf   : > { %p2592_p6 = pneg %p2591_p5 }
  0xc1   : > { %p2599_p13 = pnand %p2598_p11, %p2592_p6 }
  0xc3   : > { %2602 = shalt.err (!%p2599_p13)
}
  0xc4   : > { %2271 = dma.hbm_to_vmem [thread:$0]  (!%p2910_p0), %s3381_s9, 16, %s3034_s21, [#allocation14]  }
  0xc5   : > { %p3434_p3 = scmp.ne.s32.totalorder %s3429_s2, 0 }
  0xc6   : > { %p3435_p2 = scmp.ne.s32.totalorder (!%p3434_p3), %s3430_s19, 0 }
  0xc7   : > { %607 = sbr.rel (%p3434_p3) target bundleno = 4426 (0x114a), region = 92 }
  0xce   : > { %2664 = dma.done.wait (%p3435_p2), [#allocation5], 16  }
  0xcf   : > { %2666 = vsyncadd (%p3435_p2), [#allocation5], 4294967280 }
  0xd0   : > { %2668 = dma.done.wait (%p3435_p2), [#allocation8], 272  }
  0xd1   : > { %2670 = vsyncadd (%p3435_p2), [#allocation8], 4294967024 }
  0xd2   : > { %2672 = dma.done.wait (%p3435_p2), [#allocation11], 272  }
  0xd3   : > { %2674 = vsyncadd (%p3435_p2), [#allocation11], 4294967024 }
  0xd4   : > { %2676 = dma.done.wait (%p3435_p2), [#allocation14], 272  }
  0xd5   : > { %2678 = vsyncadd (%p3435_p2), [#allocation14], 4294967024  ;;  %s685_s18 = sand.u32 1, %s2689_s28   ;;  %p688_p0 = scmp.lt.s32.totalorder %s2701_s0, 1 }
  0xd6   : > { %s3100_s2 = sshll.u32 %s685_s18, 3  ;;  %s3436_s26 = sld [smem:[#allocation33_spill]] }
  0xd7   : > { %s3103_s24 = scalar_select %p688_p0, %s2701_s0, 1 }
  0xd8   : > { %s3437_s25 = sld [smem:[#allocation32_spill]]  ;;  %s687_s29 = scalar_lea.vmem [#allocation16], %s3100_s2 }
  0xd9   : > { %s2062_s21 = sshll.u32 %s3103_s24, 4  ;;  %p2013_p8 = scmp.ne.s32.totalorder %s2697_s30, 0 }
  0xda   : > { %vm705_vm0 = vcmask (!%p2013_p8), 261120   ;;  %v2371_v14 = vld [vmem:[#allocation7] sm:$0xff] (!%p2013_p8)   ;;  %v2372_v15 = vld [vmem:[#allocation10] sm:$0xff] (!%p2013_p8)   ;;  %v2724_v16 = vmov (!%p2013_p8), 0.0   ;;  %v2373_v17 = vld [vmem:[#allocation7 + $0x8] sm:$0xff] (!%p2013_p8)   ;;  %vm2725_vm1 = vmmov (!%p2013_p8), 0  }
  0xdb   : > { %700 = sbr.rel (%p2013_p8) target bundleno = 760 (0x2f8), region = 124  ;;  %2104 = vmatprep.subr.bf16.mxu0 (!%p2013_p8), %v2724_v16  ;;  %2112 = vmatprep.subr.bf16.mxu1 (!%p2013_p8), %v2724_v16  ;;  %v2374_v18 = vld [vmem:[#allocation10 + $0x8] sm:$0xff] (!%p2013_p8)   ;;  %v2014_v25 = vld [vmem:[%s3382_s10] ss:$0 sm:$0xff] (!%p2013_p8)  ;;  %v2016_v36 = vld [vmem:[#allocation9] ss:$0 sm:$0xff] (!%p2013_p8) }
  0xdc   : > { %s695_s19 = scalar_lea.vmem %s3436_s26, %s3103_s24  ;;  %2105 = vmatpush3.bf16.msra.mxu0 (!%p2013_p8), %v2371_v14  ;;  %2113 = vmatpush3.bf16.msra.mxu1 (!%p2013_p8), %v2372_v15  ;;  %v2015_v31 = vld [vmem:[%s3383_s11] ss:$0 sm:$0xff] (!%p2013_p8)  ;;  %v2020_v38 = vld [vmem:[#allocation12] ss:$0 sm:$0xff] (!%p2013_p8) }
  0xdd   : > { %2106 = vmatprep.subr.bf16.mxu0 (!%p2013_p8), %v2724_v16  ;;  %2114 = vmatprep.subr.bf16.mxu1 (!%p2013_p8), %v2724_v16 }
  0xde   : > { %s3113_s17 = scalar_lea.vmem %s3437_s25, %s2062_s21  ;;  %2108 = vmatprep.mubr.msk.bf16.mxu0 (!%p2013_p8), %vm2725_vm1, %v2724_v16  ;;  %2116 = vmatprep.mubr.msk.bf16.mxu1 (!%p2013_p8), %vm2725_vm1, %v2724_v16 }
  0xdf   : > { %v701_v0 = vld [vmem:[%s3113_s17] sm:$0xff] (!%p2013_p8)  ;;  %v702_v1 = vld [vmem:[%s3113_s17 + $0x8] sm:$0xff] (!%p2013_p8) }
  0xe0   : > { %v706_v2 = vsel (!%p2013_p8), %vm705_vm0, %v701_v0, 0.0  ;;  %v709_v3 = vsel (!%p2013_p8), %vm705_vm0, %v702_v1, 0.0  ;;  %2107 = vmatpush3.bf16.msra.mxu0 (!%p2013_p8), %v2373_v17  ;;  %2115 = vmatpush3.bf16.msra.mxu1 (!%p2013_p8), %v2374_v18 }
  0xe1   : > { %707 = vadd.xlane.f32.xlu0 (!%p2013_p8), %v706_v2 }
  0xe5   : > { %710 = vadd.xlane.f32.xlu0 %v709_v3 }
 0x16e   : > { %v708_v4 = vpop.xlane.xlu0 %707 }
 0x16f   : > { %v713_v5 = vmul.f32 0.03125, %v708_v4 }
 0x171   : > { %v715_v6 = vsub.f32 %v701_v0, %v713_v5 }
 0x172   : > { %v711_v7 = vpop.xlane.xlu0 %710 }
 0x173   : > { %v714_v8 = vmul.f32 0.03125, %v711_v7  ;;  %v717_v9 = vmul.f32 %v715_v6, %v715_v6  ;;  %v733_v27 = vmul.f32 %v2014_v25, %v715_v6 }
 0x175   : > { %v716_v10 = vsub.f32 %v702_v1, %v714_v8  ;;  %v719_v11 = vsel %vm705_vm0, %v717_v9, 0.0 }
 0x176   : > { %720 = vadd.xlane.f32.xlu1 %v719_v11 }
 0x177   : > { %v718_v12 = vmul.f32 %v716_v10, %v716_v10  ;;  %v734_v28 = vmul.f32 %v2014_v25, %v716_v10 }
 0x179   : > { %v722_v13 = vsel %vm705_vm0, %v718_v12, 0.0 }
 0x17a   : > { %723 = vadd.xlane.f32.xlu1 %v722_v13 }
 0x203   : > { %v721_v19 = vpop.xlane.xlu1 %720 }
 0x204   : > { %v725_v20 = vmul.f32 0.03125, %v721_v19 }
 0x206   : > { %v735_v21 = vadd.f32 1e-06, %v725_v20 }
 0x207   : > { %v724_v22 = vpop.xlane.xlu1 %723 }
 0x208   : > { %2375 = vrsqrt.f32 %v735_v21  ;;  %v726_v23 = vmul.f32 0.03125, %v724_v22 }
 0x20a   : > { %v736_v24 = vadd.f32 1e-06, %v726_v23 }
 0x20c   : > { %2377 = vrsqrt.f32 %v736_v24 }
 0x212   : > { %v2376_v26 = vpop.eup %2375 }
 0x213   : > { %v739_v29 = vmul.f32 %v2376_v26, %v733_v27 }
 0x215   : > { %v747_v33 = vadd.f32 %v2015_v31, %v739_v29 }
 0x216   : > { %v2378_v30 = vpop.eup %2377 }
 0x217   : > { %v740_v32 = vmul.f32 %v2378_v30, %v734_v28 }
 0x219   : > { %v748_v34 = vadd.f32 %v2015_v31, %v740_v32 }
 0x21b   : > { %v749_v35 = vpack.c.bf16 %v748_v34, %v747_v33 }
 0x21d   : > { %2109 = vmatmul.mubr.msk.bf16.vlgmr.msra.gmra.mrb[0].mxu0 %vm705_vm0, %v749_v35  ;;  %2117 = vmatmul.mubr.msk.bf16.vlgmr.msra.gmra.mrb[0].mxu1 %vm705_vm0, %v749_v35 }
 0x2f0   : > { %v810_v37 = vpop.f32.mrb[0].mxu0  ;;  %v876_v39 = vpop.f32.mrb[0].mxu1 }
 0x2f1   : > { %v2110_v40 = vpop.f32.mrb[1].mxu0  ;;  %v2118_v41 = vpop.f32.mrb[1].mxu1  ;;  %v811_v44 = vadd.f32 %v2016_v36, %v810_v37  ;;  %v877_v45 = vadd.f32 %v2020_v38, %v876_v39 }
 0x2f2   : > { %v813_v42 = vpop.f32.mrb[2].mxu0  ;;  %v879_v43 = vpop.f32.mrb[2].mxu1 }
 0x2f3   : > { %v814_v46 = vadd.f32 %v2016_v36, %v813_v42  ;;  %v880_v47 = vadd.f32 %v2020_v38, %v879_v43  ;;  %v2111_v48 = vpop.f32.mrb[3].mxu0  ;;  %v2119_v49 = vpop.f32.mrb[3].mxu1 }
 0x2f5   : > { %v817_v50 = vpack.c.bf16 %v814_v46, %v811_v44  ;;  %v883_v51 = vpack.c.bf16 %v880_v47, %v877_v45 }
 0x2f7   : > { %818 = vst.msk [vmem:[#allocation2] sm:$0xff] %vm705_vm0, %v817_v50  ;;  %884 = vst.msk [vmem:[#allocation3] sm:$0xff] %vm705_vm0, %v883_v51 }
 0x2f8 PF: > { %s2024_s27 = sshll.u32 %s2697_s30, 3  ;;  %vm890_vm2 = vcmask 261120   ;;  %s3438_s26 = sld [smem:[#allocation34_spill]]  ;;  %v2726_v60 = vmov 0.0   ;;  %vm2727_vm3 = vmmov 0   ;;  %vm992_vm4 = vcmask 64512  }
 0x2f9   : > { %s886_s21 = scalar_lea.vmem %s3113_s17, %s2024_s27  ;;  %2120 = vmatprep.subr.bf16.mxu1 %v2726_v60  ;;  %2124 = vmatprep.mubr.msk.bf16.mxu1 %vm2727_vm3, %v2726_v60  ;;  %s2728_s25 = smov 120   ;;  %v2025_v2 = vld [vmem:[%s3382_s10] ss:$0 sm:$0xff]  ;;  %v2027_v10 = vld [vmem:[#allocation4] ss:$0 sm:$0xff]  ;;  %v1041_v20 = vlaneseq  ;;  %vm1047_vm5 = vcmask 130048  }
 0x2fa   : > { %v3135_v52 = vld [vmem:[%s886_s21] sm:$0xff]  ;;  %2134 = vmatprep.subr.bf16.mxu0 %v2726_v60  ;;  %2136 = vmatprep.mubr.msk.bf16.mxu0 %vm2727_vm3, %v2726_v60  ;;  %s2729_s24 = smov 112   ;;  %vm1223_vm6 = vcmask 1043456   ;;  %s3440_s16 = sld [smem:[#allocation38_spill]]  ;;  %vm1777_vm7 = vcmask 523264  }
 0x2fb   : > { %v891_v53 = vsel %vm890_vm2, %v3135_v52, 0.0  ;;  %v2026_v5 = vld [vmem:[%s3383_s11] ss:$0 sm:$0xff]  ;;  %v1042_v23 = vshrl.u32 %v1041_v20, 7  ;;  %s3441_s21 = sld [smem:[#allocation35_spill]]  ;;  %s3442_s1 = sld [smem:[#allocation36_spill]] }
 0x2fc   : > { %892 = vadd.xlane.f32.xlu0 %v891_v53  ;;  %v987_v21 = vld [vmem:[%s695_s19] sm:$0x1]  ;;  %s2730_s19 = smov 104   ;;  %s3443_s15 = sld [smem:[#allocation37_spill]] }
 0x2fd   : > { %v2031_v22 = vadd.f32 -1.0, %v987_v21  ;;  %v1043_v25 = vsub.s32 0, %v1042_v23  ;;  %s2058_s20 = sshll.u32 %s2701_s0, 1  ;;  %s1839_s23 = sshll.u32 %s687_s29, 4  ;;  %s3316_s23 = int_to_ptr.vmem [resolvable:$true] %s1839_s23 }
 0x2fe   : > { %v2379_v59 = vld [vmem:[%s3438_s26] sm:$0xff]   ;;  %v2380_v61 = vld [vmem:[%s3438_s26 + $0x8] sm:$0xff]   ;;  %s1835_s27 = sadd.s32 %s2697_s30, %s2058_s20  ;;  %s3446_s17 = sld [smem:[#allocation40_spill]] }
 0x2ff   : > { %2121 = vmatpush3.bf16.msra.mxu1 %v2379_v59  ;;  %v3155_v62 = vld [vmem:[#allocation2] sm:$0xff]  ;;  %v989_v24 = vmul.f32 1e+09, %v2031_v22  ;;  %v3198_v46 = vld [vmem:[#allocation3] sm:$0xff]  ;;  %s2059_s12 = sshll.u32 %s1835_s27, 7  ;;  %s1824_s30 = scalar_lea.sflag [#allocation6], %s685_s18 }
 0x300   : > { %2122 = vmatprep.subr.bf16.mxu1 %v2726_v60  ;;  %1109 = vrot.lane.b32.xlu1 %v3155_v62, %s2728_s25  ;;  %v997_v9 = vsel %vm992_vm4, %v3155_v62, 0  ;;  %s2603_s0 = scalar_lea.vmem %s3316_s23, 128 }
 0x301   : > { %v3189_v26 = vrot.slane %v989_v24, %v1043_v25  ;;  %2135 = vmatpush3.bf16.msra.mxu0 %v3198_v46  ;;  %p2604_p10 = scmp.ne.s32.totalorder %s3316_s23, %s2603_s0 }
 0x302   : > { %2146 = vmatprep.subr.bf16.mxu0 %v2726_v60 }
 0x303   : > { %2123 = vmatpush3.bf16.msra.mxu1 %v2380_v61 }
 0x304   : > { %2128 = vmatprep.subr.bf16.mxu1 %v2726_v60  ;;  %s3314_s13 = scalar_lea.hbm %s3446_s17, %s2059_s12 }
 0x372   : > { %v1110_v12 = vpop.permute.xlu1 %1109 }
 0x373   : > { %v1115_v18 = vsel %vm992_vm4, %v1110_v12, 0 }
 0x389   : > { %v893_v54 = vpop.xlane.xlu0 %892 }
 0x38a   : > { %v895_v55 = vmul.f32 0.03125, %v893_v54 }
 0x38c   : > { %v896_v56 = vsub.f32 %v3135_v52, %v895_v55 }
 0x38e   : > { %v897_v57 = vmul.f32 %v896_v56, %v896_v56  ;;  %v908_v3 = vmul.f32 %v2025_v2, %v896_v56 }
 0x390   : > { %v898_v58 = vsel %vm890_vm2, %v897_v57, 0.0  ;;  %v1219_v57 = vld [vmem:[#allocation13 + $0x4] sm:$0xf] }
 0x391   : > { %899 = vadd.xlane.f32.xlu0 %v898_v58  ;;  %v1225_v58 = vsel %vm1223_vm6, %v1219_v57, 0 }
 0x41e   : > { %v900_v63 = vpop.xlane.xlu0 %899 }
 0x41f   : > { %v901_v0 = vmul.f32 0.03125, %v900_v63 }
 0x421   : > { %v909_v1 = vadd.f32 1e-06, %v901_v0  ;;  %v1104_v0 = vld [vmem:[#allocation13] sm:$0xf] }
 0x423   : > { %2387 = vrsqrt.f32 %v909_v1 }
 0x42d   : > { %v2388_v4 = vpop.eup %2387 }
 0x42e   : > { %v911_v6 = vmul.f32 %v2388_v4, %v908_v3  ;;  %v1271_v3 = vsel %vm1223_vm6, %v1104_v0, 0 }
 0x430   : > { %v918_v7 = vadd.f32 %v2026_v5, %v911_v6 }
 0x432   : > { %v919_v8 = vpack.c.bf16 %v918_v7, %v918_v7 }
 0x434   : > { %2125 = vmatmul.mubr.msk.bf16.vlgmr.msra.gmra.mrb[0].mxu1 %vm890_vm2, %v919_v8 }
 0x435   : > { %2129 = vmatpush3.bf16.xpose.msra.mxu1 %v997_v9  ;;  %2130 = vmatprep.mubr.msk.bf16.mxu1 %vm2727_vm3, %v2726_v60 }
 0x436   : > { %2140 = vmatprep.subr.bf16.mxu1 %v2726_v60 }
 0x507   : > { %v980_v11 = vpop.f32.mrb[0].mxu1 }
 0x508   : > { %v981_v13 = vadd.f32 %v2027_v10, %v980_v11  ;;  %v2126_v14 = vpop.f32.mrb[1].mxu1 }
 0x509   : > { %v983_v15 = vpop.f32.mrb[2].mxu1 }
 0x50a   : > { %v3171_v16 = vpack.c.bf16 %v981_v13, %v981_v13  ;;  %v2127_v17 = vpop.f32.mrb[3].mxu1 }
 0x50c   : > { %1106 = vrot.lane.b32.xlu1 %v3171_v16, %s2728_s25  ;;  %2131 = vmatmul.mubr.msk.bf16.vlgmr.msra.gmra.mrb[4].mxu1 %vm992_vm4, %v3171_v16 }
 0x50d   : > { %2141 = vmatpush3.bf16.xpose.msra.mxu1 %v1115_v18  ;;  %2142 = vmatprep.mubr.msk.bf16.mxu1 %vm2727_vm3, %v2726_v60 }
 0x50e   : > { %2152 = vmatprep.subr.bf16.mxu1 %v2726_v60 }
 0x57e   : > { %v1107_v19 = vpop.permute.xlu1 %1106 }
 0x57f   : > { %2143 = vmatmul.mubr.msk.bf16.vlgmr.msra.gmra.mrb[8].mxu1 %vm992_vm4, %v1107_v19 }
 0x580   : > { %2154 = vmatprep.mubr.msk.bf16.mxu1 %vm2727_vm3, %v2726_v60  ;;  %2153 = vmatpush3.bf16.msra.mxu1 %v1225_v58 }
 0x581   : > { %2164 = vmatprep.subr.bf16.mxu1 %v2726_v60 }
 0x5df   : > { %v1033_v27 = vpop.f32.mrb[4].mxu1 }
 0x5e0   : > { %v1039_v28 = vmul.f32 0.35355338, %v1033_v27  ;;  %v2132_v29 = vpop.f32.mrb[5].mxu1 }
 0x5e1   : > { %v1036_v30 = vpop.f32.mrb[6].mxu1 }
 0x5e2   : > { %v2133_v31 = vpop.f32.mrb[7].mxu1  ;;  %v1046_v32 = vadd.f32 %v3189_v26, %v1039_v28 }
 0x5e4   : > { %v1048_v33 = vsel %vm1047_vm5, %v1046_v32, -inf }
 0x5e5   : > { %1049 = vmax.xlane.f32.xlu0 %v1048_v33 }
 0x652   : > { %v1151_v34 = vpop.f32.mrb[8].mxu1 }
 0x653   : > { %v1157_v35 = vmul.f32 0.35355338, %v1151_v34  ;;  %v2144_v36 = vpop.f32.mrb[9].mxu1 }
 0x654   : > { %v1154_v37 = vpop.f32.mrb[10].mxu1 }
 0x655   : > { %v2145_v38 = vpop.f32.mrb[11].mxu1  ;;  %v1158_v39 = vadd.f32 %v1157_v35, %v3189_v26 }
 0x657   : > { %v1159_v40 = vsel %vm1047_vm5, %v1158_v39, -inf }
 0x658   : > { %1160 = vmax.xlane.f32.xlu1 %v1159_v40 }
 0x669   : > { %1313 = vrot.lane.b32.xlu1 %v3171_v16, %s2729_s24 }
 0x672   : > { %v1050_v41 = vpop.xlane.xlu0 %1049 }
 0x673   : > { %v1051_v42 = vsub.f32 %v1046_v32, %v1050_v41 }
 0x675   : > { %v1052_v43 = vmul.f32 1.442695, %v1051_v42 }
 0x677   : > { %2389 = vpow2.f32 %v1052_v43 }
 0x681   : > { %v2390_v44 = vpop.eup %2389 }
 0x682   : > { %v1054_v45 = vsel %vm1047_vm5, %v2390_v44, 0.0 }
 0x683   : > { %1055 = vadd.xlane.f32.xlu0 %v1054_v45 }
 0x6e5   : > { %v1161_v47 = vpop.xlane.xlu1 %1160 }
 0x6e6   : > { %v1162_v48 = vsub.f32 %v1158_v39, %v1161_v47 }
 0x6e8   : > { %v1163_v49 = vmul.f32 1.442695, %v1162_v48 }
 0x6e9   : > { %v1314_v17 = vpop.permute.xlu1 %1313 }
 0x6ea   : > { %2391 = vpow2.f32 %v1163_v49 }
 0x6f4   : > { %v2392_v50 = vpop.eup %2391 }
 0x6f5   : > { %v1165_v51 = vsel %vm1047_vm5, %v2392_v50, 0.0 }
 0x6f6   : > { %1166 = vadd.xlane.f32.xlu0 %v1165_v51 }
 0x70c   : > { %1172 = vrot.lane.b32.xlu0 %v3198_v46, %s2728_s25 }
 0x710   : > { %v1056_v53 = vpop.xlane.xlu0 %1055  ;;  %1315 = vrot.lane.b32.xlu0 %v3155_v62, %s2729_s24 }
 0x711   : > { %2393 = vrcp.f32 %v1056_v53 }
 0x71b   : > { %v2394_v54 = vpop.eup %2393 }
 0x71c   : > { %v1058_v55 = vmul.f32 %v2394_v54, %v2390_v44 }
 0x71e   : > { %v1059_v56 = vpack.c.bf16 %v1058_v55, %v1058_v55 }
 0x720   : > { %2137 = vmatmul.mubr.msk.bf16.vlgmr.msra.gmra.mrb[0].mxu0 %vm1047_vm5, %v1059_v56 }
 0x721   : > { %2148 = vmatprep.mubr.msk.bf16.mxu0 %vm2727_vm3, %v2726_v60 }
 0x783   : > { %v1167_v59 = vpop.xlane.xlu0 %1166 }
 0x784   : > { %2395 = vrcp.f32 %v1167_v59 }
 0x787   : > { %v1173_v61 = vpop.permute.xlu0 %1172 }
 0x788   : > { %2147 = vmatpush3.bf16.msra.mxu0 %v1173_v61 }
 0x789   : > { %2158 = vmatprep.subr.bf16.mxu0 %v2726_v60 }
 0x78b   : > { %v1316_v9 = vpop.permute.xlu0 %1315 }
 0x78c   : > { %v1321_v13 = vsel %vm992_vm4, %v1316_v9, 0 }
 0x78e   : > { %v2396_v63 = vpop.eup %2395 }
 0x78f   : > { %v1169_v1 = vmul.f32 %v2396_v63, %v2392_v50 }
 0x791   : > { %v1170_v2 = vpack.c.bf16 %v1169_v1, %v1169_v1 }
 0x793   : > { %2149 = vmatmul.mubr.msk.bf16.vlgmr.msra.gmra.mrb[4].mxu0 %vm1047_vm5, %v1170_v2 }
 0x794   : > { %2159 = vmatpush3.bf16.msra.mxu0 %v1271_v3  ;;  %2160 = vmatprep.mubr.msk.bf16.mxu0 %vm2727_vm3, %v2726_v60 }
 0x795   : > { %2170 = vmatprep.subr.bf16.mxu0 %v2726_v60 }
 0x7f3   : > { %v1097_v4 = vpop.f32.mrb[0].mxu0 }
 0x7f4   : > { %v1103_v5 = vpack.c.bf16 %v1097_v4, %v1097_v4  ;;  %v2138_v6 = vpop.f32.mrb[1].mxu0 }
 0x7f5   : > { %v1100_v7 = vpop.f32.mrb[2].mxu0  ;;  %v1583_v6 = vld [vmem:[#allocation13 + $0xc] sm:$0xf] }
 0x7f6   : > { %v2139_v8 = vpop.f32.mrb[3].mxu0  ;;  %2161 = vmatmul.mubr.msk.bf16.vlgmr.msra.gmra.mrb[8].mxu0 %vm992_vm4, %v1103_v5 }
 0x7f7   : > { %2172 = vmatprep.mubr.msk.bf16.mxu0 %vm2727_vm3, %v2726_v60 }
 0x866   : > { %v1212_v10 = vpop.f32.mrb[4].mxu0 }
 0x867   : > { %v1218_v11 = vpack.c.bf16 %v1212_v10, %v1212_v10  ;;  %v2150_v12 = vpop.f32.mrb[5].mxu0 }
 0x868   : > { %v1215_v14 = vpop.f32.mrb[6].mxu0 }
 0x869   : > { %v2151_v15 = vpop.f32.mrb[7].mxu0  ;;  %2155 = vmatmul.mubr.msk.bf16.vlgmr.msra.gmra.mrb[12].mxu1 %vm992_vm4, %v1218_v11 }
 0x86a   : > { %2165 = vmatpush3.bf16.xpose.msra.mxu1 %v1321_v13  ;;  %2166 = vmatprep.mubr.msk.bf16.mxu1 %vm2727_vm3, %v2726_v60 }
 0x86b   : > { %2176 = vmatprep.subr.bf16.mxu1 %v2726_v60 }
 0x871   : > { %2167 = vmatmul.mubr.msk.bf16.vlgmr.msra.gmra.mrb[16].mxu1 %vm992_vm4, %v1314_v17 }
 0x872   : > { %2178 = vmatprep.mubr.msk.bf16.mxu1 %vm2727_vm3, %v2726_v60 }
 0x8c9   : > { %v1307_v18 = vpop.f32.mrb[8].mxu0 }
 0x8ca   : > { %v2162_v19 = vpop.f32.mrb[9].mxu0 }
 0x8cb   : > { %v1310_v20 = vpop.f32.mrb[10].mxu0 }
 0x8cc   : > { %v2163_v21 = vpop.f32.mrb[11].mxu0 }
 0x93c   : > { %v1261_v22 = vpop.f32.mrb[12].mxu1 }
 0x93d   : > { %v3229_v23 = vadd.f32 %v1307_v18, %v1261_v22  ;;  %v2156_v24 = vpop.f32.mrb[13].mxu1  ;;  %v2044_v22 = vld [vmem:[#allocation15] ss:$0 sm:$0xff] }
 0x93e   : > { %v1264_v25 = vpop.f32.mrb[14].mxu1 }
 0x93f   : > { %v2157_v27 = vpop.f32.mrb[15].mxu1 }
 0x944   : > { %v1357_v28 = vpop.f32.mrb[16].mxu1 }
 0x945   : > { %v1363_v29 = vmul.f32 0.35355338, %v1357_v28  ;;  %v2168_v30 = vpop.f32.mrb[17].mxu1 }
 0x946   : > { %v1360_v31 = vpop.f32.mrb[18].mxu1 }
 0x947   : > { %v2169_v32 = vpop.f32.mrb[19].mxu1  ;;  %v1364_v33 = vadd.f32 %v1363_v29, %v3189_v26 }
 0x949   : > { %v1365_v34 = vsel %vm1047_vm5, %v1364_v33, -inf }
 0x94a   : > { %1366 = vmax.xlane.f32.xlu0 %v1365_v34 }
 0x960   : > { %1377 = vrot.lane.b32.xlu0 %v3198_v46, %s2729_s24 }
 0x964   : > { %1472 = vrot.lane.b32.xlu0 %v3171_v16, %s2730_s19 }
 0x9d7   : > { %v1367_v35 = vpop.xlane.xlu0 %1366 }
 0x9d8   : > { %v1368_v36 = vsub.f32 %v1364_v33, %v1367_v35 }
 0x9da   : > { %v1369_v37 = vmul.f32 1.442695, %v1368_v36  ;;  %v2381_v36 = vld [vmem:[%s3386_s14] sm:$0xff]  }
 0x9db   : > { %v1378_v38 = vpop.permute.xlu0 %1377 }
 0x9dc   : > { %2397 = vpow2.f32 %v1369_v37  ;;  %2171 = vmatpush3.bf16.msra.mxu0 %v1378_v38  ;;  %v2383_v37 = vld [vmem:[%s3440_s16] sm:$0xff]   ;;  %v2384_v38 = vld [vmem:[%s3440_s16 + $0x8] sm:$0xff]  }
 0x9dd   : > { %2182 = vmatprep.subr.bf16.mxu0 %v2726_v60 }
 0x9df   : > { %v1473_v47 = vpop.permute.xlu0 %1472 }
 0x9e6   : > { %v2398_v39 = vpop.eup %2397 }
 0x9e7   : > { %v1371_v40 = vsel %vm1047_vm5, %v2398_v39, 0.0 }
 0x9e8   : > { %1372 = vadd.xlane.f32.xlu1 %v1371_v40 }
 0x9f9   : > { %1474 = vrot.lane.b32.xlu1 %v3155_v62, %s2730_s19  ;;  %v1424_v62 = vld [vmem:[#allocation13 + $0x8] sm:$0xf] }
 0x9fa   : > { %v1429_v48 = vsel %vm1223_vm6, %v1424_v62, 0 }
 0x9fb   : > { %2177 = vmatpush3.bf16.msra.mxu1 %v1429_v48  ;;  %v2385_v48 = vld [vmem:[%s3440_s16 + $0x10] sm:$0xff]  }
 0x9fc   : > { %2188 = vmatprep.subr.bf16.mxu1 %v2726_v60 }
 0xa75   : > { %v1373_v41 = vpop.xlane.xlu1 %1372 }
 0xa76   : > { %2399 = vrcp.f32 %v1373_v41 }
 0xa79   : > { %v1475_v43 = vpop.permute.xlu1 %1474 }
 0xa7a   : > { %v1480_v44 = vsel %vm992_vm4, %v1475_v43, 0 }
 0xa80   : > { %v2400_v42 = vpop.eup %2399 }
 0xa81   : > { %v1375_v16 = vmul.f32 %v2400_v42, %v2398_v39  ;;  %v2045_v42 = vld [vmem:[%s3441_s21] ss:$0 sm:$0xff] }
 0xa83   : > { %v1376_v45 = vpack.c.bf16 %v1375_v16, %v1375_v16 }
 0xa85   : > { %2173 = vmatmul.mubr.msk.bf16.vlgmr.msra.gmra.mrb[12].mxu0 %vm1047_vm5, %v1376_v45 }
 0xa86   : > { %2183 = vmatpush3.bf16.xpose.msra.mxu0 %v1480_v44  ;;  %2184 = vmatprep.mubr.msk.bf16.mxu0 %vm2727_vm3, %v2726_v60  ;;  %v2046_v44 = vld [vmem:[%s3442_s1] ss:$0 sm:$0xff]  ;;  %s3445_s1 = sld [smem:[#allocation28_spill]] }
 0xa87   : > { %2194 = vmatprep.subr.bf16.mxu0 %v2726_v60 }
 0xa8c   : > { %p3447_p12 = scmp.ne.s32.totalorder %s3445_s1, 0 }
 0xa8d   : > { %2185 = vmatmul.mubr.msk.bf16.vlgmr.msra.gmra.mrb[16].mxu0 %vm992_vm4, %v1473_v47 }
 0xa8e   : > { %2196 = vmatprep.mubr.msk.bf16.mxu0 %vm2727_vm3, %v2726_v60  ;;  %p2605_p1 = pnand %p2604_p10, %p3447_p12 }
 0xa90   : > { %p2606_p4 = pneg %p2605_p1 }
 0xb58   : > { %v1417_v49 = vpop.f32.mrb[12].mxu0 }
 0xb59   : > { %v1423_v50 = vpack.c.bf16 %v1417_v49, %v1417_v49  ;;  %v2174_v51 = vpop.f32.mrb[13].mxu0  ;;  %v2386_v49 = vld [vmem:[%s3440_s16 + $0x18] sm:$0xff]  }
 0xb5a   : > { %v1420_v53 = vpop.f32.mrb[14].mxu0 }
 0xb5b   : > { %v2175_v54 = vpop.f32.mrb[15].mxu0  ;;  %2179 = vmatmul.mubr.msk.bf16.vlgmr.msra.gmra.mrb[20].mxu1 %vm992_vm4, %v1423_v50  ;;  %v2047_v50 = vld [vmem:[%s3443_s15] ss:$0 sm:$0xff]  ;;  %s2731_s15 = smov [#allocation16]  }
 0xb5c   : > { %2190 = vmatprep.mubr.msk.bf16.mxu1 %vm2727_vm3, %v2726_v60  ;;  %s2607_s20 = sshll.u32 %s2731_s15, 4  ;;  %s2608_s20 = int_to_ptr.vmem [resolvable:$false] %s2607_s20 }
 0xb5d   : > { %s2609_s27 = scalar_lea.vmem %s2608_s20, 256  ;;  %p2610_p5 = scmp.lt.s32.totalorder %s3316_s23, %s2608_s20 }
 0xb5e   : > { %p2611_p6 = scmp.lt.s32.totalorder %s2609_s27, %s2603_s0 }
 0xb60   : > { %v1516_v55 = vpop.f32.mrb[16].mxu0  ;;  %p2612_p7 = por %p2611_p6, %p2610_p5 }
 0xb61   : > { %v1522_v56 = vmul.f32 0.35355338, %v1516_v55  ;;  %v2186_v57 = vpop.f32.mrb[17].mxu0 }
 0xb62   : > { %v1519_v58 = vpop.f32.mrb[18].mxu0  ;;  %p2613_p9 = pnand %p2612_p7, %p2606_p4 }
 0xb63   : > { %v2187_v59 = vpop.f32.mrb[19].mxu0  ;;  %v1523_v61 = vadd.f32 %v1522_v56, %v3189_v26  ;;  %v1588_v26 = vsel %vm1223_vm6, %v1583_v6, 0 }
 0xb64   : > { %2195 = vmatpush3.bf16.msra.mxu0 %v1588_v26 }
 0xb65   : > { %v1524_v63 = vsel %vm1047_vm5, %v1523_v61, -inf  ;;  %2208 = vmatprep.subr.bf16.mxu0 %v2726_v60 }
 0xb66   : > { %1525 = vmax.xlane.f32.xlu0 %v1524_v63 }
 0xb7c   : > { %1536 = vrot.lane.b32.xlu0 %v3198_v46, %s2730_s19  ;;  %s3444_s19 = sld [smem:[#allocation39_spill]] }
 0xbf3   : > { %v1526_v0 = vpop.xlane.xlu0 %1525 }
 0xbf4   : > { %v1527_v1 = vsub.f32 %v1523_v61, %v1526_v0 }
 0xbf6   : > { %v1528_v2 = vmul.f32 1.442695, %v1527_v1 }
 0xbf7   : > { %v1537_v5 = vpop.permute.xlu0 %1536 }
 0xbf8   : > { %2401 = vpow2.f32 %v1528_v2  ;;  %2189 = vmatpush3.bf16.msra.mxu1 %v1537_v5 }
 0xbf9   : > { %2200 = vmatprep.subr.bf16.mxu1 %v2726_v60 }
 0xc02   : > { %v2402_v3 = vpop.eup %2401 }
 0xc03   : > { %v1530_v4 = vsel %vm1047_vm5, %v2402_v3, 0.0 }
 0xc04   : > { %1531 = vadd.xlane.f32.xlu1 %v1530_v4 }
 0xc2e   : > { %v1465_v7 = vpop.f32.mrb[20].mxu1 }
 0xc2f   : > { %v1471_v46 = vadd.f32 %v1465_v7, %v3229_v23  ;;  %v2180_v8 = vpop.f32.mrb[21].mxu1 }
 0xc30   : > { %v1468_v9 = vpop.f32.mrb[22].mxu1 }
 0xc31   : > { %v2181_v10 = vpop.f32.mrb[23].mxu1 }
 0xc91   : > { %v1532_v11 = vpop.xlane.xlu1 %1531 }
 0xc92   : > { %2403 = vrcp.f32 %v1532_v11 }
 0xc9c   : > { %v2404_v12 = vpop.eup %2403 }
 0xc9d   : > { %v1534_v13 = vmul.f32 %v2404_v12, %v2402_v3 }
 0xc9f   : > { %v1535_v14 = vpack.c.bf16 %v1534_v13, %v1534_v13 }
 0xca1   : > { %2191 = vmatmul.mubr.msk.bf16.vlgmr.msra.gmra.mrb[24].mxu1 %vm1047_vm5, %v1535_v14 }
 0xca2   : > { %2204 = vmatprep.mubr.msk.bf16.mxu1 %vm2727_vm3, %v2726_v60  ;;  %2201 = vmatpush3.bf16.msra.mxu1 %v2381_v36 }
 0xca3   : > { %2202 = vmatprep.subr.bf16.mxu1 %v2726_v60 }
 0xd74   : > { %v1576_v15 = vpop.f32.mrb[24].mxu1 }
 0xd75   : > { %v1582_v17 = vpack.c.bf16 %v1576_v15, %v1576_v15  ;;  %v2192_v18 = vpop.f32.mrb[25].mxu1 }
 0xd76   : > { %v1579_v19 = vpop.f32.mrb[26].mxu1 }
 0xd77   : > { %v2193_v20 = vpop.f32.mrb[27].mxu1  ;;  %2197 = vmatmul.mubr.msk.bf16.vlgmr.msra.gmra.mrb[20].mxu0 %vm992_vm4, %v1582_v17 }
 0xd78   : > { %2216 = vmatprep.mubr.msk.bf16.mxu0 %vm2727_vm3, %v2726_v60  ;;  %2209 = vmatpush3.bf16.msra.mxu0 %v2383_v37 }
 0xd79   : > { %2210 = vmatprep.subr.bf16.mxu0 %v2726_v60 }
 0xd7c   : > { %2211 = vmatpush3.bf16.msra.mxu0 %v2384_v38 }
 0xd7d   : > { %2212 = vmatprep.subr.bf16.mxu0 %v2726_v60 }
 0xd80   : > { %2213 = vmatpush3.bf16.msra.mxu0 %v2385_v48 }
 0xd81   : > { %2214 = vmatprep.subr.bf16.mxu0 %v2726_v60  ;;  %v2051_v60 = vld [vmem:[%s3444_s19] ss:$0 sm:$0xff] }
 0xd84   : > { %2215 = vmatpush3.bf16.msra.mxu0 %v2386_v49 }
 0xe4a   : > { %v1624_v21 = vpop.f32.mrb[20].mxu0 }
 0xe4b   : > { %v1630_v23 = vadd.f32 %v1624_v21, %v1471_v46  ;;  %v2198_v24 = vpop.f32.mrb[21].mxu0 }
 0xe4c   : > { %v1627_v25 = vpop.f32.mrb[22].mxu0 }
 0xe4d   : > { %v1638_v27 = vadd.f32 %v2044_v22, %v1630_v23  ;;  %v2199_v28 = vpop.f32.mrb[23].mxu0 }
 0xe4f   : > { %v1639_v29 = vadd.f32 %v1638_v27, %v3135_v52  ;;  %v2382_v52 = vld [vmem:[%s3386_s14 + $0x8] sm:$0xff]  }
 0xe50   : > { %2203 = vmatpush3.bf16.msra.mxu1 %v2382_v52 }
 0xe51   : > { %v1642_v30 = vsel %vm890_vm2, %v1639_v29, 0.0 }
 0xe52   : > { %1643 = vadd.xlane.f32.xlu1 %v1642_v30 }
 0xedf   : > { %v1644_v31 = vpop.xlane.xlu1 %1643 }
 0xee0   : > { %v1645_v32 = vmul.f32 0.03125, %v1644_v31 }
 0xee2   : > { %v1646_v33 = vsub.f32 %v1639_v29, %v1645_v32 }
 0xee4   : > { %v1647_v34 = vmul.f32 %v1646_v33, %v1646_v33  ;;  %v1658_v43 = vmul.f32 %v2045_v42, %v1646_v33 }
 0xee6   : > { %v1648_v35 = vsel %vm890_vm2, %v1647_v34, 0.0 }
 0xee7   : > { %1649 = vadd.xlane.f32.xlu1 %v1648_v35 }
 0xf74   : > { %v1650_v39 = vpop.xlane.xlu1 %1649 }
 0xf75   : > { %v1651_v40 = vmul.f32 0.03125, %v1650_v39 }
 0xf77   : > { %v1659_v41 = vadd.f32 1e-06, %v1651_v40 }
 0xf79   : > { %2405 = vrsqrt.f32 %v1659_v41 }
 0xf83   : > { %v2406_v16 = vpop.eup %2405 }
 0xf84   : > { %v1661_v45 = vmul.f32 %v2406_v16, %v1658_v43 }
 0xf86   : > { %v1668_v47 = vadd.f32 %v2046_v44, %v1661_v45 }
 0xf88   : > { %v1669_v62 = vpack.c.bf16 %v1668_v47, %v1668_v47 }
 0xf8a   : > { %2205 = vmatmul.mubr.msk.bf16.vlgmr.msra.gmra.mrb[28].mxu1 %vm890_vm2, %v1669_v62 }
0x105d   : > { %v1730_v51 = vpop.f32.mrb[28].mxu1 }
0x105e   : > { %v1731_v53 = vadd.f32 %v2047_v50, %v1730_v51  ;;  %v2206_v54 = vpop.f32.mrb[29].mxu1 }
0x105f   : > { %v1733_v55 = vpop.f32.mrb[30].mxu1 }
0x1060   : > { %v1736_v56 = vmax.f32 %v1731_v53, 0.0  ;;  %v2207_v57 = vpop.f32.mrb[31].mxu1 }
0x1062   : > { %v1737_v58 = vpack.c.bf16 %v1736_v56, %v1736_v56 }
0x1064   : > { %2217 = vmatmul.mubr.msk.bf16.vlgmr.msra.gmra.mrb[24].mxu0 %vm1777_vm7, %v1737_v58 }
0x1137   : > { %v1815_v59 = vpop.f32.mrb[24].mxu0 }
0x1138   : > { %v1816_v61 = vadd.f32 %v2051_v60, %v1815_v59  ;;  %v2218_v63 = vpop.f32.mrb[25].mxu0 }
0x1139   : > { %v1818_v0 = vpop.f32.mrb[26].mxu0 }
0x113a   : > { %v1821_v1 = vadd.f32 %v1816_v61, %v1639_v29  ;;  %v2219_v2 = vpop.f32.mrb[27].mxu0 }
0x113c   : > { %1822 = vst.msk [vmem:[%s687_s29] sm:$0xff] %vm890_vm2, %v1821_v1 }
0x113d   : > { %2616 = shalt.err (!%p2613_p9)
}
0x113e   : > { %s2617_s18 = scalar_lea.hbm %s3314_s13, 128  ;;  %s2621_s21 = scalar_lea.hbm %s3446_s17, 512 }
0x113f   : > { %p2618_p11 = scmp.ne.s32.totalorder %s3314_s13, %s2617_s18  ;;  %p2622_p2 = scmp.lt.u32.totalorder %s3314_s13, %s3446_s17 }
0x1140   : > { %p2623_p0 = scmp.lt.u32.totalorder %s2621_s21, %s2617_s18  ;;  %p2625_p10 = scmp.lt.u32.totalorder %s2617_s18, %s3314_s13 }
0x1141   : > { %p2619_p13 = pnand %p2618_p11, %p3447_p12 }
0x1142   : > { %p2624_p8 = por %p2623_p0, %p2622_p2 }
0x1143   : > { %p2620_p3 = pneg %p2619_p13 }
0x1144   : > { %p2626_p1 = por %p2625_p10, %p2624_p8 }
0x1146   : > { %p2627_p4 = pnand %p2626_p1, %p2620_p3 }
0x1148   : > { %2630 = shalt.err (!%p2627_p4)
}
0x1149   : > { %2248 = dma.vmem_to_hbm [thread:$0]  (%p3447_p12), %s3316_s23, 128, %s3314_s13, %s1824_s30  }
0x114a PF: > { %s3448_s12 = sld [smem:[#allocation26_spill]]  ;;  %s3449_s22 = sld [smem:[#allocation22_spill]] }
0x114b   : > { %s3450_s25 = sld [smem:[#allocation30_spill]] }
0x1150   : > { %p2290_p5 = scmp.ge.s32.totalorder %s3448_s12, 2  ;;  %s1851_s0 = sand.u32 1, %s3449_s22  }
0x1151   : > { %p3451_p6 = scmp.ne.s32.totalorder %s3450_s25, 0  ;;  %s1852_s15 = scalar_lea.sflag [#allocation6], %s1851_s0 }
0x1153   : > { %p2273_p7 = pnand %p2290_p5, %p3451_p6 }
0x1155   : > { %2680 = dma.done.wait (!%p2273_p7), %s1852_s15, 128  }
0x1156   : > { %2682 = vsyncadd (!%p2273_p7), %s1852_s15, 4294967168  ;;  %s35_s20 = sadd.s32 1, %s3448_s12   ;;  %s3452_s18 = sld [smem:[#allocation23_spill]] }
0x1157   : > { %p32_p9 = scmp.ge.s32.totalorder %s35_s20, 6   ;;  %s3453_s29 = sld [smem:[#allocation31_spill]] }
0x1158   : > { %s3454_s30 = sld [smem:[#allocation24_spill]]  ;;  %s3455_s0 = sld [smem:[#allocation25_spill]] }
0x1159   : > { %s3456_s19 = sld [smem:[#allocation27_spill]]  ;;  %s3457_s1 = sld [smem:[#allocation29_spill]] }
0x115a   : > { %s3458_s27 = smov %s2689_s28  ;;  %34 = sbr.rel (!%p32_p9) target bundleno = 19 (0x13), region = 164 }
0x115c   : > { %s3459_s28 = smov %s3452_s18 }
0x1161   :  { %1857 = vsyncpa [#allocation5], 1 }
0x1162   :  { %1859 = vsyncpa [#allocation5 + $0x1], 1 }
0x1163   :  { %1860 = vsyncpa [#allocation8], 1 }
0x1164   :  { %1861 = vsyncpa [#allocation11], 1 }
0x1165   :  { %1862 = vsyncpa [#allocation14], 1 }
0x1166   :  { %1863 = vsyncpa [#allocation6], 1 }
0x1167   :  { %1865 = vsyncpa [#allocation6 + $0x1], 1 }

</bundles_post_ra>
